<compile_context>
chip_gen: v7x
topology: tpu7x:2x2x1
jax: 0.10.0
libtpu: 0.0.40
codegen_flags: <defaults>
</compile_context>

<pallas_src>
import functools

import numpy as np
import jax
import jax.numpy as jnp
from jax.experimental import pallas as pl
from jax.experimental.pallas import tpu as pltpu


# ---------------------------------------------------------------------------
# Kernel body (shared by both paths):  out = z @ w_t + b
# z_ref: (tm|Mp, Z), w_ref: (Z, N), b_ref: (1, N), o_ref: (tm|Mp, N)
# ---------------------------------------------------------------------------
def _hypernet_simple_kernel(z_ref, w_ref, b_ref, o_ref):
    o_ref[...] = (
        jnp.dot(
            z_ref[...],
            w_ref[...],
            preferred_element_type=jnp.float32,
            precision=jax.lax.Precision.HIGHEST,  # pin f32-accurate MXU passes
        )
        + b_ref[...]
    )


def _round_up(x, m):
    return ((x + m - 1) // m) * m


def hypernet_simple_forward(z, w_t, b2d, *, single_block_max_m=256, tm=256):
    """Forward of HyperNetworkSimple.

    z    : (M, Z) or (Z,) float32   -- embedding(s)
    w_t  : (Z, N) float32           -- torch weight.T, built once at init
    b2d  : (1, N) float32           -- torch bias, pre-shaped once at init
    returns (M, N) (or (N,) if z was 1-D) float32, matching F.linear(z, W, b).
    """
    squeeze = z.ndim == 1
    if squeeze:
        z = z[None, :]
    M, Z = z.shape
    Z2, N = w_t.shape
    assert Z == Z2 and b2d.shape == (1, N)

    use_single_block = M <= single_block_max_m
    # Pad M so the output store is full-sublane (and tiles divide evenly).
    Mp = _round_up(max(M, 1), 8) if use_single_block else _round_up(M, tm)
    if Mp != M:
        z = jnp.pad(z, ((0, Mp - M), (0, 0)))

    cost = pl.CostEstimate(
        flops=2 * Mp * Z * N,
        transcendentals=0,
        bytes_accessed=4 * (Mp * Z + Z * N + N + Mp * N),
    )

    if use_single_block:
        # Grid-free single shot: whole arrays live once in VMEM, single
        # buffered, no pipeline prologue/revolve logic.
        out = pl.pallas_call(
            _hypernet_simple_kernel,
            out_shape=jax.ShapeDtypeStruct((Mp, N), jnp.float32),
            in_specs=[pl.BlockSpec(memory_space=pltpu.MemorySpace.VMEM)] * 3,
            out_specs=pl.BlockSpec(memory_space=pltpu.MemorySpace.VMEM),
            cost_estimate=cost,
        )(z, w_t, b2d)
    else:
        # Large-batch path: tile M, keep weight/bias resident (block index
        # constant across the grid), shard the parallel M axis across cores.
        out = pl.pallas_call(
            _hypernet_simple_kernel,
            out_shape=jax.ShapeDtypeStruct((Mp, N), jnp.float32),
            grid=(Mp // tm,),
            in_specs=[
                pl.BlockSpec((tm, Z), lambda i: (i, 0)),
                pl.BlockSpec((Z, N), lambda i: (0, 0)),
                pl.BlockSpec((1, N), lambda i: (0, 0)),
            ],
            out_specs=pl.BlockSpec((tm, N), lambda i: (i, 0)),
            compiler_params=pltpu.CompilerParams(
                dimension_semantics=("parallel",)
            ),
            cost_estimate=cost,
        )(z, w_t, b2d)

    if Mp != M:
        out = out[:M]
    return out[0] if squeeze else out


# ---------------------------------------------------------------------------
# Deterministic parameter init mirroring torch __init__ (same shapes / dists):
#   std = sqrt(1 / (unit_dim * z_dim)); bound = sqrt(3) * std
#   weight ~ U(-bound, bound), shape (out_size*unit_dim, z_dim); bias = 0
# Kernel-layout copies (w_t, b2d) are built once here, so the per-call HLO is
# just pad (if needed) + one pallas_call (+ slice).
# ---------------------------------------------------------------------------
def init_hypernet_simple(key, z_dim, out_size, unit_weight_vec_size):
    N = out_size * unit_weight_vec_size
    std = np.sqrt(1.0 / (unit_weight_vec_size * z_dim))
    bound = float(np.sqrt(3.0) * std)
    weight = jax.random.uniform(key, (N, z_dim), jnp.float32, -bound, bound)
    bias = jnp.zeros((N,), jnp.float32)
    return dict(
        weight=weight,                 # torch layout, used only by the reference
        bias=bias,
        w_t=jnp.asarray(weight.T),     # kernel layout (Z, N), built once
        b2d=bias.reshape(1, N),        # (1, N), built once
    )


# ---------------------------------------------------------------------------
# Host-side float64 reference mirroring torch.nn.functional.linear(z, W, b).
# (numpy so the comparison is against true-precision results.)
# ---------------------------------------------------------------------------
def ref_forward(z, weight, bias):
    z64 = np.asarray(z, dtype=np.float64)
    w64 = np.asarray(weight, dtype=np.float64)
    b64 = np.asarray(bias, dtype=np.float64)
    return z64 @ w64.T + b64


if __name__ == "__main__":
    # z_dim=8, out_size=8, unit_weight_vec_size=784 -> N = 6272 (49 * 128,
    # lane-dense output).
    z_dim, out_size, unit = 8, 8, 784
    N = out_size * unit

    key = jax.random.PRNGKey(0)
    k_w, k_z, k_zb = jax.random.split(key, 3)

    params = init_hypernet_simple(k_w, z_dim, out_size, unit)

    fwd = jax.jit(hypernet_simple_forward)

    # 1) Small batch (M=4, padded to 8 internally) -> single-block path.
    z_batch = jax.random.normal(k_z, (4, z_dim), jnp.float32)
    out = jax.block_until_ready(fwd(z_batch, params["w_t"], params["b2d"]))
    assert out.shape == (4, N), out.shape
    assert out.dtype == jnp.float32
    ref = ref_forward(z_batch, params["weight"], params["bias"])
    np.testing.assert_allclose(np.asarray(out), ref, rtol=1e-5, atol=1e-5)

    # 2) Single 1-D embedding (F.linear also accepts 1-D input).
    z1 = z_batch[0]
    out1 = jax.block_until_ready(fwd(z1, params["w_t"], params["b2d"]))
    assert out1.shape == (N,), out1.shape
    ref1 = ref_forward(z1, params["weight"], params["bias"])
    np.testing.assert_allclose(np.asarray(out1), ref1, rtol=1e-5, atol=1e-5)

    # 3) Larger ES-style batch -> exercises the M-tiled, megacore-parallel path.
    #    Thresholds shrunk so the test stays small: M=256, tm=128 -> grid=(2,).
    fwd_tiled = jax.jit(
        functools.partial(hypernet_simple_forward, single_block_max_m=64, tm=128)
    )
    z_big = jax.random.normal(k_zb, (256, z_dim), jnp.float32)
    out_big = jax.block_until_ready(
        fwd_tiled(z_big, params["w_t"], params["b2d"])
    )
    assert out_big.shape == (256, N), out_big.shape
    ref_big = ref_forward(z_big, params["weight"], params["bias"])
    np.testing.assert_allclose(np.asarray(out_big), ref_big, rtol=1e-5, atol=1e-5)

    print("KERNEL_OK")
</pallas_src>

<mosaic_0001>
module attributes {stable_mosaic.version = 11 : i64} {
  func.func @_hypernet_simple_kernel(%arg0: memref<8x8xf32, #tpu.memory_space<vmem>>, %arg1: memref<8x6272xf32, #tpu.memory_space<vmem>>, %arg2: memref<1x6272xf32, #tpu.memory_space<vmem>>, %arg3: memref<8x6272xf32, #tpu.memory_space<vmem>>) attributes {dimension_semantics = [], scalar_prefetch = 0 : i64, scratch_operands = 0 : i64, tpu.core_type = #tpu.core_type<tc>} {
    %c0 = arith.constant 0 : index
    %c0_0 = arith.constant 0 : index
    %0 = vector.load %arg0[%c0, %c0_0] : memref<8x8xf32, #tpu.memory_space<vmem>>, vector<8x8xf32>
    %c0_1 = arith.constant 0 : index
    %c0_2 = arith.constant 0 : index
    %1 = vector.load %arg1[%c0_1, %c0_2] : memref<8x6272xf32, #tpu.memory_space<vmem>>, vector<8x6272xf32>
    %cst = arith.constant dense<0.000000e+00> : vector<8x6272xf32>
    %2 = tpu.matmul %0, %1, %cst {dimension_numbers = #tpu.dot_dimension_numbers<[1], [0], [0], [1], [0, 0, 1, 1], [], []>, precision = #tpu.contract_precision<fp32>} : vector<8x8xf32>, vector<8x6272xf32>, vector<8x6272xf32> -> vector<8x6272xf32>
    %c0_3 = arith.constant 0 : index
    %c0_4 = arith.constant 0 : index
    %3 = vector.load %arg2[%c0_3, %c0_4] : memref<1x6272xf32, #tpu.memory_space<vmem>>, vector<1x6272xf32>
    %4 = vector.broadcast %3 : vector<1x6272xf32> to vector<8x6272xf32>
    %5 = arith.addf %2, %4 : vector<8x6272xf32>
    %c0_5 = arith.constant 0 : index
    %c0_6 = arith.constant 0 : index
    %6 = vector.load %arg3[%c0_5, %c0_6] : memref<8x6272xf32, #tpu.memory_space<vmem>>, vector<8x6272xf32>
    tpu.vector_store %arg3[%c0_5, %c0_6], %5 {strides = array<i32>} : memref<8x6272xf32, #tpu.memory_space<vmem>>, vector<8x6272xf32>,
    return
  }
}

</mosaic_0001>

<bundles_post_ra>
// kernel: hypernet_simple_forward.1
= control target key start
LH: loop header
LB: loop body
LE: loop exit
PB: predicated region body
PF: predicated region fallthrough
CT: control target
= control target key end

     0   :  { %8 = vsyncpa [#allocation3], 0  ;;  %s13459_s0 = inlined_call_operand.vmem [shape: f32[8,8], index: 0, kind: input, shape index: {}]   ;;  %s13460_s1 = inlined_call_operand.hbm [shape: f32[8,6272], index: 1, kind: input, shape index: {}]   ;;  %s13461_s2 = inlined_call_operand.hbm [shape: f32[1,6272], index: 2, kind: input, shape index: {}]   ;;  %s13462_s3 = inlined_call_operand.vmem [shape: f32[8,6272], index: 3, kind: output, shape index: {}]  }
   0x1   :  { %9 = vsyncpa [#allocation5], 0  ;;  %s12406_s12 = smov [#allocation2]   ;;  %s12407_s14 = smov [#allocation4]  }
   0x2   :  { %s18_s13 = sshll.u32 %s12406_s12, 4  ;;  %s28_s15 = sshll.u32 %s12407_s14, 4  ;;  %s19_s13 = int_to_ptr.vmem [resolvable:$true] %s18_s13  ;;  %s29_s15 = int_to_ptr.vmem [resolvable:$true] %s28_s15 }
   0x3   :  { %s12358_s18 = scalar_lea.hbm %s13460_s1, 6272 }
   0x4   :  { %p12359_p0 = scmp.ne.s32.totalorder %s13460_s1, %s12358_s18  ;;  %p12362_p1 = scmp.lt.u32.totalorder %s12358_s18, %s13460_s1 }
   0x6   :  { %p12364_p2 = pnand %p12362_p1, %p12359_p0 }
   0x8   :  { %12367 = shalt.err (!%p12364_p2)
}
   0x9   :  { %s12368_s23 = scalar_lea.vmem %s19_s13, 6272  ;;  %p12373_p4 = scmp.lt.s32.totalorder %s19_s13, %s19_s13 }
   0xa   :  { %p12369_p3 = scmp.ne.s32.totalorder %s19_s13, %s12368_s23  ;;  %p12374_p5 = scmp.lt.s32.totalorder %s12368_s23, %s12368_s23 }
   0xc   :  { %p12375_p6 = por %p12374_p5, %p12373_p4 }
   0xe   :  { %p12376_p7 = pnand %p12375_p6, %p12369_p3 }
  0x10   :  { %12379 = shalt.err (!%p12376_p7)
}
  0x11   :  { %21 = dma.hbm_to_vmem [thread:$0]  %s13460_s1, 6272, %s19_s13, [#allocation3]  }
  0x12   :  { %s12380_s28 = scalar_lea.hbm %s13461_s2, 784 }
  0x13   :  { %p12381_p8 = scmp.ne.s32.totalorder %s13461_s2, %s12380_s28  ;;  %p12384_p9 = scmp.lt.u32.totalorder %s12380_s28, %s13461_s2 }
  0x15   :  { %p12386_p10 = pnand %p12384_p9, %p12381_p8 }
  0x17   :  { %12389 = shalt.err (!%p12386_p10)
}
  0x18   :  { %s12390_s6 = scalar_lea.vmem %s29_s15, 784  ;;  %s12394_s7 = scalar_lea.vmem %s29_s15, 800 }
  0x19   :  { %p12391_p11 = scmp.ne.s32.totalorder %s29_s15, %s12390_s6  ;;  %p12395_p12 = scmp.lt.s32.totalorder %s29_s15, %s29_s15 }
  0x1a   :  { %p12396_p13 = scmp.lt.s32.totalorder %s12394_s7, %s12390_s6 }
  0x1c   :  { %p12397_p0 = por %p12396_p13, %p12395_p12 }
  0x1e   :  { %p12398_p1 = pnand %p12397_p0, %p12391_p11 }
  0x20   :  { %12401 = shalt.err (!%p12398_p1)
}
  0x21   :  { %31 = dma.hbm_to_vmem [thread:$0]  %s13461_s2, 784, %s29_s15, [#allocation5]  }
  0x22   :  { %12402 = dma.done.wait [#allocation3], 6272  }
  0x23   :  { %12403 = vsyncadd [#allocation3], 4294961024 }
  0x24   :  { %12404 = dma.done.wait [#allocation5], 784  }
  0x25   :  { %12405 = vsyncadd [#allocation5], 4294966512  ;;  %v12408_v0 = vmov 0.0   ;;  %vm347_vm0 = vcmask 64512   ;;  %v40_v1 = vld [vmem:[#allocation2 + $0x8] sm:$0xff]  ;;  %v39_v2 = vld [vmem:[#allocation2] sm:$0xff] }
  0x26   :  { %654 = vmatprep.mubr.f32.mxu0 %v12408_v0  ;;  %417 = vmatprep.mubr.f32.mxu1 %v12408_v0  ;;  %v38_v3 = vld [vmem:[%s13459_s0] sm:$0xff]  ;;  %v351_v4 = vand.u32 4294901760, %v40_v1  ;;  %v353_v5 = vand.u32 4294901760, %v39_v2  ;;  %v44_v10 = vld [vmem:[#allocation2 + $0x28] sm:$0xff]  ;;  %v42_v18 = vld [vmem:[#allocation2 + $0x18] sm:$0xff]  ;;  %vm12409_vm1 = vmmov 0  }
  0x27   :  { %v349_v6 = vsel %vm347_vm0, %v38_v3, 0  ;;  %v12467_v15 = vand.u32 4294901760, %v44_v10  ;;  %v43_v19 = vld [vmem:[#allocation2 + $0x20] sm:$0xff]  ;;  %v12475_v24 = vand.u32 4294901760, %v42_v18  ;;  %v41_v26 = vld [vmem:[#allocation2 + $0x10] sm:$0xff]  ;;  %v48_v44 = vld [vmem:[#allocation2 + $0x48] sm:$0xff] }
  0x28   :  { %v12459_v7 = vand.u32 4294901760, %v349_v6  ;;  %589 = vmatprep.subr.mxu0 %v351_v4  ;;  %v436_v8 = vsub.f32 %v39_v2, %v353_v5  ;;  %352 = vmatprep.subr.mxu1 %v351_v4  ;;  %v430_v9 = vsub.f32 %v40_v1, %v351_v4  ;;  %v12477_v25 = vand.u32 4294901760, %v43_v19  ;;  %v46_v46 = vld [vmem:[#allocation2 + $0x38] sm:$0xff]  ;;  %v47_v47 = vld [vmem:[#allocation2 + $0x40] sm:$0xff]  ;;  %v45_v50 = vld [vmem:[#allocation2 + $0x30] sm:$0xff] }
  0x29   :  { %591 = vmatpush1.msra.mxu0 %v353_v5  ;;  %354 = vmatpush1.msra.mxu1 %v353_v5  ;;  %v1360_v27 = vsub.f32 %v44_v10, %v12467_v15  ;;  %v12482_v28 = vand.u32 4294901760, %v41_v26  ;;  %v895_v30 = vsub.f32 %v42_v18, %v12475_v24  ;;  %v12515_v45 = vand.u32 4294901760, %v48_v44 }
  0x2a   :  { %v12462_v11 = vsub.f32 %v349_v6, %v12459_v7  ;;  %v431_v12 = vand.u32 4294901760, %v430_v9  ;;  %v437_v13 = vand.u32 4294901760, %v436_v8  ;;  %v1366_v29 = vsub.f32 %v43_v19, %v12477_v25 }
  0x2b   :  { %v1361_v31 = vand.u32 4294901760, %v1360_v27  ;;  %v901_v32 = vsub.f32 %v41_v26, %v12482_v28  ;;  %v896_v33 = vand.u32 4294901760, %v895_v30  ;;  %v12520_v48 = vand.u32 4294901760, %v46_v46 }
  0x2c   :  { %v12465_v14 = vand.u32 4294901760, %v12462_v11  ;;  %v432_v16 = vsub.f32 %v430_v9, %v431_v12  ;;  %v438_v17 = vsub.f32 %v436_v8, %v437_v13  ;;  %667 = vmatprep.subr.mxu0 %v431_v12  ;;  %v1367_v35 = vand.u32 4294901760, %v1366_v29 }
  0x2d   :  { %v1362_v34 = vsub.f32 %v1360_v27, %v1361_v31  ;;  %v902_v36 = vand.u32 4294901760, %v901_v32  ;;  %v897_v37 = vsub.f32 %v895_v30, %v896_v33  ;;  %v12522_v49 = vand.u32 4294901760, %v47_v47 }
  0x2e   :  { %658 = vmatmul.mubr.f32.vlgmr.msra.gmra.mrb[0].mxu0 %v12465_v14  ;;  %v421_v20 = vsub.f32 %v12462_v11, %v12465_v14  ;;  %v433_v21 = vand.u32 4294901760, %v432_v16  ;;  %v439_v22 = vand.u32 4294901760, %v438_v17  ;;  %v1368_v39 = vsub.f32 %v1366_v29, %v1367_v35 }
  0x2f   :  { %671 = vmatpush1.msra.mxu0 %v437_v13  ;;  %734 = vmatprep.mubr.f32.mxu0 %v12408_v0  ;;  %v1363_v38 = vand.u32 4294901760, %v1362_v34  ;;  %v903_v40 = vsub.f32 %v901_v32, %v902_v36  ;;  %v898_v41 = vand.u32 4294901760, %v897_v37  ;;  %v2290_v51 = vsub.f32 %v48_v44, %v12515_v45  ;;  %v49_v13 = vld [vmem:[#allocation2 + $0x50] sm:$0xff] }
  0x30   :  { %v12473_v23 = vand.u32 4294901760, %v421_v20  ;;  %743 = vmatprep.subr.mxu0 %v351_v4  ;;  %434 = vmatprep.subr.mxu1 %v433_v21  ;;  %v1369_v42 = vand.u32 4294901760, %v1368_v39  ;;  %v12527_v52 = vand.u32 4294901760, %v45_v50  ;;  %v2296_v53 = vsub.f32 %v47_v47, %v12522_v49  ;;  %v53_v39 = vld [vmem:[#allocation2 + $0x70] sm:$0xff] }
  0x31   :  { %v904_v43 = vand.u32 4294901760, %v903_v40  ;;  %v1825_v54 = vsub.f32 %v46_v46, %v12520_v48  ;;  %v2291_v55 = vand.u32 4294901760, %v2290_v51  ;;  %v12575_v16 = vand.u32 4294901760, %v49_v13 }
  0x32   :  { %423 = vmatmul.mubr.f32.vlgmr.msra.gmra.mrb[0].mxu1 %v12473_v23  ;;  %v1831_v56 = vsub.f32 %v45_v50, %v12527_v52  ;;  %v2297_v59 = vand.u32 4294901760, %v2296_v53 }
  0x33   :  { %440 = vmatpush1.msra.mxu1 %v439_v22  ;;  %503 = vmatprep.mubr.f32.mxu1 %v12408_v0  ;;  %v1826_v57 = vand.u32 4294901760, %v1825_v54  ;;  %v2292_v58 = vsub.f32 %v2290_v51, %v2291_v55  ;;  %v2761_v20 = vsub.f32 %v49_v13, %v12575_v16 }
  0x34   :  { %513 = vmatprep.subr.mxu1 %v430_v9  ;;  %v1832_v60 = vand.u32 4294901760, %v1831_v56  ;;  %v2298_v63 = vsub.f32 %v2296_v53, %v2297_v59  ;;  %v51_v9 = vld [vmem:[#allocation2 + $0x60] sm:$0xff] }
  0x35   :  { %v1827_v61 = vsub.f32 %v1825_v54, %v1826_v57  ;;  %v2293_v62 = vand.u32 4294901760, %v2292_v58  ;;  %v12570_v12 = vand.u32 4294901760, %v51_v9 }
  0x36   :  { %736 = vmatmul.mubr.f32.vlgmr.msra.gmra.mrb[0].mxu0 %v12459_v7  ;;  %v1833_v1 = vsub.f32 %v1831_v56, %v1832_v60  ;;  %v2299_v3 = vand.u32 4294901760, %v2298_v63  ;;  %v57_v63 = vld [vmem:[#allocation2 + $0x90] sm:$0xff] }
  0x37   :  { %745 = vmatpush1.msra.mxu0 %v353_v5  ;;  %808 = vmatprep.mubr.f32.mxu0 %v12408_v0  ;;  %v1828_v2 = vand.u32 4294901760, %v1827_v61  ;;  %v52_v5 = vld [vmem:[#allocation2 + $0x68] sm:$0xff]  ;;  %v3226_v17 = vsub.f32 %v51_v9, %v12570_v12 }
  0x38   :  { %1282 = vmatprep.subr.mxu0 %v12467_v15  ;;  %v1834_v4 = vand.u32 4294901760, %v1833_v1  ;;  %v12563_v6 = vand.u32 4294901760, %v52_v5 }
  0x3a   :  { %505 = vmatmul.mubr.f32.vlgmr.msra.gmra.mrb[0].mxu1 %v12459_v7 }
  0x3b   :  { %516 = vmatpush1.msra.mxu1 %v436_v8  ;;  %579 = vmatprep.mubr.f32.mxu1 %v12408_v0  ;;  %v50_v8 = vld [vmem:[#allocation2 + $0x58] sm:$0xff] }
  0x3c   :  { %817 = vmatprep.subr.mxu1 %v12475_v24  ;;  %v12568_v10 = vand.u32 4294901760, %v50_v8 }
  0x3e   :  { %810 = vmatmul.mubr.f32.vlgmr.msra.gmra.mrb[0].mxu0 %v12459_v7  ;;  %v2755_v18 = vsub.f32 %v50_v8, %v12568_v10 }
  0x3f   :  { %1284 = vmatpush1.msra.mxu0 %v12477_v25  ;;  %1347 = vmatprep.mubr.f32.mxu0 %v12408_v0 }
  0x40   :  { %1364 = vmatprep.subr.mxu0 %v1363_v38  ;;  %v2756_v21 = vand.u32 4294901760, %v2755_v18 }
  0x42   :  { %582 = vmatmul.mubr.f32.vlgmr.msra.gmra.mrb[0].mxu1 %v12462_v11  ;;  %1353 = vmatmul.mubr.f32.vlgmr.msra.gmra.mrb[2].mxu0 %v12473_v23  ;;  %v2757_v26 = vsub.f32 %v2755_v18, %v2756_v21 }
  0x43   :  { %819 = vmatpush1.msra.mxu1 %v12482_v28  ;;  %882 = vmatprep.mubr.f32.mxu1 %v12408_v0 }
  0x44   :  { %899 = vmatprep.subr.mxu1 %v898_v41  ;;  %1370 = vmatpush1.msra.mxu0 %v1369_v42  ;;  %v12623_v41 = vand.u32 4294901760, %v53_v39 }
  0x45   :  { %1433 = vmatprep.mubr.f32.mxu0 %v12408_v0  ;;  %1443 = vmatprep.subr.mxu0 %v1360_v27 }
  0x46   :  { %888 = vmatmul.mubr.f32.vlgmr.msra.gmra.mrb[2].mxu1 %v12473_v23 }
  0x47   :  { %905 = vmatpush1.msra.mxu1 %v904_v43  ;;  %968 = vmatprep.mubr.f32.mxu1 %v12408_v0 }
  0x48   :  { %978 = vmatprep.subr.mxu1 %v895_v30  ;;  %v2758_v30 = vand.u32 4294901760, %v2757_v26  ;;  %v63_v26 = vld [vmem:[#allocation2 + $0xc0] sm:$0xff] }
  0x4a   :  { %1435 = vmatmul.mubr.f32.vlgmr.msra.gmra.mrb[2].mxu0 %v12459_v7 }
  0x4b   :  { %1446 = vmatpush1.msra.mxu0 %v1366_v29  ;;  %1509 = vmatprep.mubr.f32.mxu0 %v12408_v0 }
  0x4c   :  { %1519 = vmatprep.subr.mxu0 %v12467_v15 }
  0x4e   :  { %970 = vmatmul.mubr.f32.vlgmr.msra.gmra.mrb[2].mxu1 %v12459_v7 }
  0x4f   :  { %981 = vmatpush1.msra.mxu1 %v901_v32  ;;  %1044 = vmatprep.mubr.f32.mxu1 %v12408_v0 }
  0x50   :  { %1054 = vmatprep.subr.mxu1 %v12475_v24 }
  0x52   :  { %1512 = vmatmul.mubr.f32.vlgmr.msra.gmra.mrb[2].mxu0 %v12462_v11 }
  0x53   :  { %1521 = vmatpush1.msra.mxu0 %v12477_v25  ;;  %1584 = vmatprep.mubr.f32.mxu0 %v12408_v0 }
  0x54   :  { %1597 = vmatprep.subr.mxu0 %v1361_v31 }
  0x56   :  { %1047 = vmatmul.mubr.f32.vlgmr.msra.gmra.mrb[2].mxu1 %v12462_v11 }
  0x57   :  { %1056 = vmatpush1.msra.mxu1 %v12482_v28  ;;  %1119 = vmatprep.mubr.f32.mxu1 %v12408_v0 }
  0x58   :  { %1132 = vmatprep.subr.mxu1 %v896_v33  ;;  %v56_v33 = vld [vmem:[#allocation2 + $0x88] sm:$0xff] }
  0x59   :  { %v12611_v34 = vand.u32 4294901760, %v56_v33 }
  0x5a   :  { %1588 = vmatmul.mubr.f32.vlgmr.msra.gmra.mrb[2].mxu0 %v12465_v14 }
  0x5b   :  { %1601 = vmatpush1.msra.mxu0 %v1367_v35  ;;  %1664 = vmatprep.mubr.f32.mxu0 %v12408_v0  ;;  %v54_v35 = vld [vmem:[#allocation2 + $0x78] sm:$0xff]  ;;  %v4150_v40 = vsub.f32 %v56_v33, %v12611_v34  ;;  %v12730_v33 = vld [vmem:[#allocation4] sm:$0xff] }
  0x5c   :  { %1673 = vmatprep.subr.mxu0 %v12467_v15  ;;  %v3220_v15 = vsub.f32 %v52_v5, %v12563_v6  ;;  %v12616_v37 = vand.u32 4294901760, %v54_v35 }
  0x5d   :  { %v4151_v44 = vand.u32 4294901760, %v4150_v40 }
  0x5e   :  { %1123 = vmatmul.mubr.f32.vlgmr.msra.gmra.mrb[2].mxu1 %v12465_v14  ;;  %v3221_v19 = vand.u32 4294901760, %v3220_v15  ;;  %v3685_v43 = vsub.f32 %v54_v35, %v12616_v37 }
  0x5f   :  { %1136 = vmatpush1.msra.mxu1 %v902_v36  ;;  %1199 = vmatprep.mubr.f32.mxu1 %v12408_v0  ;;  %v55_v36 = vld [vmem:[#allocation2 + $0x80] sm:$0xff]  ;;  %v4152_v47 = vsub.f32 %v4150_v40, %v4151_v44 }
  0x60   :  { %1208 = vmatprep.subr.mxu1 %v12475_v24  ;;  %v3222_v22 = vsub.f32 %v3220_v15, %v3221_v19  ;;  %v3227_v24 = vand.u32 4294901760, %v3226_v17  ;;  %v12618_v38 = vand.u32 4294901760, %v55_v36  ;;  %v3686_v46 = vand.u32 4294901760, %v3685_v43 }
  0x62   :  { %1666 = vmatmul.mubr.f32.vlgmr.msra.gmra.mrb[2].mxu0 %v12459_v7  ;;  %v3223_v27 = vand.u32 4294901760, %v3222_v22  ;;  %v4156_v42 = vsub.f32 %v55_v36, %v12618_v38  ;;  %v3687_v50 = vsub.f32 %v3685_v43, %v3686_v46  ;;  %v102_v22 = vlaneseq }
  0x63   :  { %1675 = vmatpush1.msra.mxu0 %v12477_v25  ;;  %1738 = vmatprep.mubr.f32.mxu0 %v12408_v0  ;;  %v2762_v25 = vand.u32 4294901760, %v2761_v20 }
  0x64   :  { %2212 = vmatprep.subr.mxu0 %v12515_v45 }
  0x65   :  { %v2763_v29 = vsub.f32 %v2761_v20, %v2762_v25 }
  0x66   :  { %1201 = vmatmul.mubr.f32.vlgmr.msra.gmra.mrb[2].mxu1 %v12459_v7 }
  0x67   :  { %1210 = vmatpush1.msra.mxu1 %v12482_v28  ;;  %1273 = vmatprep.mubr.f32.mxu1 %v12408_v0  ;;  %v3228_v28 = vsub.f32 %v3226_v17, %v3227_v24  ;;  %v2764_v32 = vand.u32 4294901760, %v2763_v29  ;;  %v12721_v29 = vand.u32 4294901760, %v63_v26 }
  0x68   :  { %1747 = vmatprep.subr.mxu1 %v12520_v48 }
  0x69   :  { %v3229_v31 = vand.u32 4294901760, %v3228_v28  ;;  %v12740_v36 = vsub.f32 %v63_v26, %v12721_v29 }
  0x6a   :  { %1740 = vmatmul.mubr.f32.vlgmr.msra.gmra.mrb[2].mxu0 %v12459_v7 }
  0x6b   :  { %2214 = vmatpush1.msra.mxu0 %v12522_v49  ;;  %2277 = vmatprep.mubr.f32.mxu0 %v12408_v0 }
  0x6c   :  { %2294 = vmatprep.subr.mxu0 %v2293_v62 }
  0x6e   :  { %1275 = vmatmul.mubr.f32.vlgmr.msra.gmra.mrb[2].mxu1 %v12459_v7  ;;  %2283 = vmatmul.mubr.f32.vlgmr.msra.gmra.mrb[4].mxu0 %v12473_v23 }
  0x6f   :  { %1749 = vmatpush1.msra.mxu1 %v12527_v52  ;;  %1812 = vmatprep.mubr.f32.mxu1 %v12408_v0 }
  0x70   :  { %1829 = vmatprep.subr.mxu1 %v1828_v2  ;;  %2300 = vmatpush1.msra.mxu0 %v2299_v3  ;;  %v12671_v2 = vand.u32 4294901760, %v57_v63 }
  0x71   :  { %2363 = vmatprep.mubr.f32.mxu0 %v12408_v0  ;;  %2373 = vmatprep.subr.mxu0 %v2290_v51  ;;  %v4153_v51 = vand.u32 4294901760, %v4152_v47 }
  0x72   :  { %1818 = vmatmul.mubr.f32.vlgmr.msra.gmra.mrb[4].mxu1 %v12473_v23 }
  0x73   :  { %1835 = vmatpush1.msra.mxu1 %v1834_v4  ;;  %1898 = vmatprep.mubr.f32.mxu1 %v12408_v0 }
  0x74   :  { %1908 = vmatprep.subr.mxu1 %v1825_v54  ;;  %v3688_v54 = vand.u32 4294901760, %v3687_v50 }
  0x76   :  { %2365 = vmatmul.mubr.f32.vlgmr.msra.gmra.mrb[4].mxu0 %v12459_v7 }
  0x77   :  { %2376 = vmatpush1.msra.mxu0 %v2296_v53  ;;  %2439 = vmatprep.mubr.f32.mxu0 %v12408_v0 }
  0x78   :  { %2449 = vmatprep.subr.mxu0 %v12515_v45 }
  0x7a   :  { %1900 = vmatmul.mubr.f32.vlgmr.msra.gmra.mrb[4].mxu1 %v12459_v7 }
  0x7b   :  { %1911 = vmatpush1.msra.mxu1 %v1831_v56  ;;  %1974 = vmatprep.mubr.f32.mxu1 %v12408_v0 }
  0x7c   :  { %1984 = vmatprep.subr.mxu1 %v12520_v48 }
  0x7e   :  { %2442 = vmatmul.mubr.f32.vlgmr.msra.gmra.mrb[4].mxu0 %v12462_v11 }
  0x7f   :  { %2451 = vmatpush1.msra.mxu0 %v12522_v49  ;;  %2514 = vmatprep.mubr.f32.mxu0 %v12408_v0 }
  0x80   :  { %2527 = vmatprep.subr.mxu0 %v2291_v55 }
  0x82   :  { %1977 = vmatmul.mubr.f32.vlgmr.msra.gmra.mrb[4].mxu1 %v12462_v11 }
  0x83   :  { %1986 = vmatpush1.msra.mxu1 %v12527_v52  ;;  %2049 = vmatprep.mubr.f32.mxu1 %v12408_v0 }
  0x84   :  { %2062 = vmatprep.subr.mxu1 %v1826_v57  ;;  %v60_v57 = vld [vmem:[#allocation2 + $0xa8] sm:$0xff] }
  0x85   :  { %v12659_v58 = vand.u32 4294901760, %v60_v57 }
  0x86   :  { %2518 = vmatmul.mubr.f32.vlgmr.msra.gmra.mrb[4].mxu0 %v12465_v14 }
  0x87   :  { %2531 = vmatpush1.msra.mxu0 %v2297_v59  ;;  %2594 = vmatprep.mubr.f32.mxu0 %v12408_v0  ;;  %v58_v59 = vld [vmem:[#allocation2 + $0x98] sm:$0xff]  ;;  %v5080_v1 = vsub.f32 %v60_v57, %v12659_v58 }
  0x88   :  { %2603 = vmatprep.subr.mxu0 %v12515_v45  ;;  %v3691_v45 = vsub.f32 %v53_v39, %v12623_v41  ;;  %v12664_v61 = vand.u32 4294901760, %v58_v59 }
  0x89   :  { %v5081_v5 = vand.u32 4294901760, %v5080_v1 }
  0x8a   :  { %2053 = vmatmul.mubr.f32.vlgmr.msra.gmra.mrb[4].mxu1 %v12465_v14  ;;  %v4615_v4 = vsub.f32 %v58_v59, %v12664_v61 }
  0x8b   :  { %2066 = vmatpush1.msra.mxu1 %v1832_v60  ;;  %2129 = vmatprep.mubr.f32.mxu1 %v12408_v0  ;;  %v59_v60 = vld [vmem:[#allocation2 + $0xa0] sm:$0xff]  ;;  %v5082_v9 = vsub.f32 %v5080_v1, %v5081_v5 }
  0x8c   :  { %2138 = vmatprep.subr.mxu1 %v12520_v48  ;;  %v4157_v48 = vand.u32 4294901760, %v4156_v42  ;;  %v12666_v62 = vand.u32 4294901760, %v59_v60  ;;  %v4616_v8 = vand.u32 4294901760, %v4615_v4 }
  0x8e   :  { %2596 = vmatmul.mubr.f32.vlgmr.msra.gmra.mrb[4].mxu0 %v12459_v7  ;;  %v5086_v3 = vsub.f32 %v59_v60, %v12666_v62  ;;  %v4617_v13 = vsub.f32 %v4615_v4, %v4616_v8 }
  0x8f   :  { %2605 = vmatpush1.msra.mxu0 %v12522_v49  ;;  %2668 = vmatprep.mubr.f32.mxu0 %v12408_v0  ;;  %v3692_v49 = vand.u32 4294901760, %v3691_v45 }
  0x90   :  { %3142 = vmatprep.subr.mxu0 %v12563_v6 }
  0x91   :  { %v3693_v53 = vsub.f32 %v3691_v45, %v3692_v49 }
  0x92   :  { %2131 = vmatmul.mubr.f32.vlgmr.msra.gmra.mrb[4].mxu1 %v12459_v7 }
  0x93   :  { %2140 = vmatpush1.msra.mxu1 %v12527_v52  ;;  %2203 = vmatprep.mubr.f32.mxu1 %v12408_v0  ;;  %v4158_v52 = vsub.f32 %v4156_v42, %v4157_v48  ;;  %v3694_v56 = vand.u32 4294901760, %v3693_v53 }
  0x94   :  { %2677 = vmatprep.subr.mxu1 %v12568_v10 }
  0x95   :  { %v4159_v55 = vand.u32 4294901760, %v4158_v52 }
  0x96   :  { %2670 = vmatmul.mubr.f32.vlgmr.msra.gmra.mrb[4].mxu0 %v12459_v7 }
  0x97   :  { %3144 = vmatpush1.msra.mxu0 %v12570_v12  ;;  %3207 = vmatprep.mubr.f32.mxu0 %v12408_v0 }
  0x98   :  { %3224 = vmatprep.subr.mxu0 %v3223_v27  ;;  %v12715_v27 = vshrl.u32 %v102_v22, 7 }
  0x9a   :  { %2205 = vmatmul.mubr.f32.vlgmr.msra.gmra.mrb[4].mxu1 %v12459_v7  ;;  %3213 = vmatmul.mubr.f32.vlgmr.msra.gmra.mrb[6].mxu0 %v12473_v23 }
  0x9b   :  { %2679 = vmatpush1.msra.mxu1 %v12575_v16  ;;  %2742 = vmatprep.mubr.f32.mxu1 %v12408_v0 }
  0x9c   :  { %2759 = vmatprep.subr.mxu1 %v2758_v30  ;;  %3230 = vmatpush1.msra.mxu0 %v3229_v31  ;;  %v61_v30 = vld [vmem:[#allocation2 + $0xb0] sm:$0xff] }
  0x9d   :  { %3293 = vmatprep.mubr.f32.mxu0 %v12408_v0  ;;  %3303 = vmatprep.subr.mxu0 %v3220_v15  ;;  %v5083_v15 = vand.u32 4294901760, %v5082_v9  ;;  %v12736_v35 = vand.u32 4294901760, %v61_v30 }
  0x9e   :  { %2748 = vmatmul.mubr.f32.vlgmr.msra.gmra.mrb[6].mxu1 %v12473_v23 }
  0x9f   :  { %2765 = vmatpush1.msra.mxu1 %v2764_v32  ;;  %2828 = vmatprep.mubr.f32.mxu1 %v12408_v0  ;;  %v12728_v32 = vsub.s32 0, %v12715_v27 }
  0xa0   :  { %2838 = vmatprep.subr.mxu1 %v2755_v18  ;;  %v4618_v18 = vand.u32 4294901760, %v4617_v13  ;;  %v12828_v13 = vsub.s32 3, %v12715_v27 }
  0xa2   :  { %3295 = vmatmul.mubr.f32.vlgmr.msra.gmra.mrb[6].mxu0 %v12459_v7 }
  0xa3   :  { %3306 = vmatpush1.msra.mxu0 %v3226_v17  ;;  %3369 = vmatprep.mubr.f32.mxu0 %v12408_v0 }
  0xa4   :  { %3379 = vmatprep.subr.mxu0 %v12563_v6 }
  0xa6   :  { %2830 = vmatmul.mubr.f32.vlgmr.msra.gmra.mrb[6].mxu1 %v12459_v7 }
  0xa7   :  { %2841 = vmatpush1.msra.mxu1 %v2761_v20  ;;  %2904 = vmatprep.mubr.f32.mxu1 %v12408_v0 }
  0xa8   :  { %2914 = vmatprep.subr.mxu1 %v12568_v10 }
  0xaa   :  { %3372 = vmatmul.mubr.f32.vlgmr.msra.gmra.mrb[6].mxu0 %v12462_v11 }
  0xab   :  { %3381 = vmatpush1.msra.mxu0 %v12570_v12  ;;  %3444 = vmatprep.mubr.f32.mxu0 %v12408_v0 }
  0xac   :  { %3457 = vmatprep.subr.mxu0 %v3221_v19 }
  0xae   :  { %2907 = vmatmul.mubr.f32.vlgmr.msra.gmra.mrb[6].mxu1 %v12462_v11 }
  0xaf   :  { %2916 = vmatpush1.msra.mxu1 %v12575_v16  ;;  %2979 = vmatprep.mubr.f32.mxu1 %v12408_v0 }
  0xb0   :  { %2992 = vmatprep.subr.mxu1 %v2756_v21  ;;  %v64_v21 = vld [vmem:[#allocation2 + $0xc8] sm:$0xff] }
  0xb2   :  { %3448 = vmatmul.mubr.f32.vlgmr.msra.gmra.mrb[6].mxu0 %v12465_v14 }
  0xb3   :  { %3461 = vmatpush1.msra.mxu0 %v3227_v24  ;;  %3524 = vmatprep.mubr.f32.mxu0 %v12408_v0  ;;  %v12712_v24 = vand.u32 4294901760, %v64_v21 }
  0xb4   :  { %3533 = vmatprep.subr.mxu0 %v12563_v6  ;;  %v12680_v6 = vsub.f32 %v57_v63, %v12671_v2  ;;  %v66_v63 = vld [vmem:[#allocation2 + $0xd8] sm:$0xff] }
  0xb5   :  { %v12724_v31 = vsub.f32 %v64_v21, %v12712_v24 }
  0xb6   :  { %2983 = vmatmul.mubr.f32.vlgmr.msra.gmra.mrb[6].mxu1 %v12465_v14 }
  0xb7   :  { %2996 = vmatpush1.msra.mxu1 %v2762_v25  ;;  %3059 = vmatprep.mubr.f32.mxu1 %v12408_v0  ;;  %v62_v25 = vld [vmem:[#allocation2 + $0xb8] sm:$0xff] }
  0xb8   :  { %3068 = vmatprep.subr.mxu1 %v12568_v10  ;;  %v5087_v10 = vand.u32 4294901760, %v5086_v3  ;;  %v12719_v28 = vand.u32 4294901760, %v62_v25 }
  0xba   :  { %3526 = vmatmul.mubr.f32.vlgmr.msra.gmra.mrb[6].mxu0 %v12459_v7 }
  0xbb   :  { %3535 = vmatpush1.msra.mxu0 %v12570_v12  ;;  %3598 = vmatprep.mubr.f32.mxu0 %v12408_v0  ;;  %v4622_v12 = vand.u32 4294901760, %v12680_v6 }
  0xbc   :  { %4072 = vmatprep.subr.mxu0 %v12611_v34 }
  0xbd   :  { %v4623_v17 = vsub.f32 %v12680_v6, %v4622_v12 }
  0xbe   :  { %3061 = vmatmul.mubr.f32.vlgmr.msra.gmra.mrb[6].mxu1 %v12459_v7 }
  0xbf   :  { %3070 = vmatpush1.msra.mxu1 %v12575_v16  ;;  %3133 = vmatprep.mubr.f32.mxu1 %v12408_v0  ;;  %v5088_v16 = vsub.f32 %v5086_v3, %v5087_v10  ;;  %v4624_v20 = vand.u32 4294901760, %v4623_v17 }
  0xc0   :  { %3607 = vmatprep.subr.mxu1 %v12616_v37 }
  0xc1   :  { %v5089_v19 = vand.u32 4294901760, %v5088_v16 }
  0xc2   :  { %3600 = vmatmul.mubr.f32.vlgmr.msra.gmra.mrb[6].mxu0 %v12459_v7 }
  0xc3   :  { %4074 = vmatpush1.msra.mxu0 %v12618_v38  ;;  %4137 = vmatprep.mubr.f32.mxu0 %v12408_v0 }
  0xc4   :  { %4154 = vmatprep.subr.mxu0 %v4153_v51 }
  0xc6   :  { %3135 = vmatmul.mubr.f32.vlgmr.msra.gmra.mrb[6].mxu1 %v12459_v7  ;;  %4143 = vmatmul.mubr.f32.vlgmr.msra.gmra.mrb[8].mxu0 %v12473_v23 }
  0xc7   :  { %3609 = vmatpush1.msra.mxu1 %v12623_v41  ;;  %3672 = vmatprep.mubr.f32.mxu1 %v12408_v0 }
  0xc8   :  { %3689 = vmatprep.subr.mxu1 %v3688_v54  ;;  %4160 = vmatpush1.msra.mxu0 %v4159_v55 }
  0xc9   :  { %4223 = vmatprep.mubr.f32.mxu0 %v12408_v0  ;;  %4233 = vmatprep.subr.mxu0 %v4150_v40 }
  0xca   :  { %3678 = vmatmul.mubr.f32.vlgmr.msra.gmra.mrb[8].mxu1 %v12473_v23 }
  0xcb   :  { %3695 = vmatpush1.msra.mxu1 %v3694_v56  ;;  %3758 = vmatprep.mubr.f32.mxu1 %v12408_v0 }
  0xcc   :  { %3768 = vmatprep.subr.mxu1 %v3685_v43  ;;  %v12754_v43 = vsub.f32 %v61_v30, %v12736_v35 }
  0xce   :  { %4225 = vmatmul.mubr.f32.vlgmr.msra.gmra.mrb[8].mxu0 %v12459_v7  ;;  %v5552_v51 = vand.u32 4294901760, %v12754_v43 }
  0xcf   :  { %4236 = vmatpush1.msra.mxu0 %v4156_v42  ;;  %4299 = vmatprep.mubr.f32.mxu0 %v12408_v0 }
  0xd0   :  { %4309 = vmatprep.subr.mxu0 %v12611_v34  ;;  %v5553_v57 = vsub.f32 %v12754_v43, %v5552_v51 }
  0xd2   :  { %3760 = vmatmul.mubr.f32.vlgmr.msra.gmra.mrb[8].mxu1 %v12459_v7  ;;  %v5554_v60 = vand.u32 4294901760, %v5553_v57 }
  0xd3   :  { %3771 = vmatpush1.msra.mxu1 %v3691_v45  ;;  %3834 = vmatprep.mubr.f32.mxu1 %v12408_v0 }
  0xd4   :  { %3844 = vmatprep.subr.mxu1 %v12616_v37 }
  0xd6   :  { %4302 = vmatmul.mubr.f32.vlgmr.msra.gmra.mrb[8].mxu0 %v12462_v11 }
  0xd7   :  { %4311 = vmatpush1.msra.mxu0 %v12618_v38  ;;  %4374 = vmatprep.mubr.f32.mxu0 %v12408_v0 }
  0xd8   :  { %4387 = vmatprep.subr.mxu0 %v4151_v44 }
  0xda   :  { %3837 = vmatmul.mubr.f32.vlgmr.msra.gmra.mrb[8].mxu1 %v12462_v11 }
  0xdb   :  { %3846 = vmatpush1.msra.mxu1 %v12623_v41  ;;  %3909 = vmatprep.mubr.f32.mxu1 %v12408_v0 }
  0xdc   :  { %3922 = vmatprep.subr.mxu1 %v3686_v46  ;;  %v6017_v46 = vand.u32 4294901760, %v12740_v36 }
  0xde   :  { %4378 = vmatmul.mubr.f32.vlgmr.msra.gmra.mrb[8].mxu0 %v12465_v14  ;;  %v6018_v55 = vsub.f32 %v12740_v36, %v6017_v46 }
  0xdf   :  { %4391 = vmatpush1.msra.mxu0 %v4157_v48  ;;  %4454 = vmatprep.mubr.f32.mxu0 %v12408_v0 }
  0xe0   :  { %4463 = vmatprep.subr.mxu0 %v12611_v34  ;;  %v12734_v34 = vsub.s32 1, %v12715_v27  ;;  %v6019_v59 = vand.u32 4294901760, %v6018_v55 }
  0xe2   :  { %3913 = vmatmul.mubr.f32.vlgmr.msra.gmra.mrb[8].mxu1 %v12465_v14  ;;  %v109_v42 = vrot.slane %v12730_v33, %v12734_v34 }
  0xe3   :  { %3926 = vmatpush1.msra.mxu1 %v3692_v49  ;;  %3989 = vmatprep.mubr.f32.mxu1 %v12408_v0 }
  0xe4   :  { %3998 = vmatprep.subr.mxu1 %v12616_v37  ;;  %v12743_v37 = vsub.f32 %v62_v25, %v12719_v28  ;;  %v117_v25 = vrot.slane %v12730_v33, %v12828_v13 }
  0xe6   :  { %4456 = vmatmul.mubr.f32.vlgmr.msra.gmra.mrb[8].mxu0 %v12459_v7  ;;  %v5546_v44 = vand.u32 4294901760, %v12743_v37 }
  0xe7   :  { %4465 = vmatpush1.msra.mxu0 %v12618_v38  ;;  %4528 = vmatprep.mubr.f32.mxu0 %v12408_v0  ;;  %v6011_v38 = vand.u32 4294901760, %v12724_v31 }
  0xe8   :  { %5002 = vmatprep.subr.mxu0 %v12659_v58  ;;  %v5547_v53 = vsub.f32 %v12743_v37, %v5546_v44 }
  0xe9   :  { %v6012_v45 = vsub.f32 %v12724_v31, %v6011_v38 }
  0xea   :  { %3991 = vmatmul.mubr.f32.vlgmr.msra.gmra.mrb[8].mxu1 %v12459_v7 }
  0xeb   :  { %4000 = vmatpush1.msra.mxu1 %v12623_v41  ;;  %4063 = vmatprep.mubr.f32.mxu1 %v12408_v0  ;;  %v105_v41 = vrot.slane %v12730_v33, %v12728_v32  ;;  %v6013_v54 = vand.u32 4294901760, %v6012_v45 }
  0xec   :  { %4537 = vmatprep.subr.mxu1 %v12664_v61 }
  0xee   :  { %4530 = vmatmul.mubr.f32.vlgmr.msra.gmra.mrb[8].mxu0 %v12459_v7 }
  0xef   :  { %5004 = vmatpush1.msra.mxu0 %v12666_v62  ;;  %5067 = vmatprep.mubr.f32.mxu0 %v12408_v0 }
  0xf0   :  { %5084 = vmatprep.subr.mxu0 %v5083_v15 }
  0xf2   :  { %4065 = vmatmul.mubr.f32.vlgmr.msra.gmra.mrb[8].mxu1 %v12459_v7  ;;  %5073 = vmatmul.mubr.f32.vlgmr.msra.gmra.mrb[10].mxu0 %v12473_v23 }
  0xf3   :  { %4539 = vmatpush1.msra.mxu1 %v12671_v2  ;;  %4602 = vmatprep.mubr.f32.mxu1 %v12408_v0 }
  0xf4   :  { %4619 = vmatprep.subr.mxu1 %v4618_v18  ;;  %5090 = vmatpush1.msra.mxu0 %v5089_v19 }
  0xf5   :  { %5153 = vmatprep.mubr.f32.mxu0 %v12408_v0  ;;  %5163 = vmatprep.subr.mxu0 %v5080_v1  ;;  %v67_v1 = vld [vmem:[#allocation2 + $0xe0] sm:$0xff] }
  0xf6   :  { %4608 = vmatmul.mubr.f32.vlgmr.msra.gmra.mrb[10].mxu1 %v12473_v23 }
  0xf7   :  { %4625 = vmatpush1.msra.mxu1 %v4624_v20  ;;  %4688 = vmatprep.mubr.f32.mxu1 %v12408_v0 }
  0xf8   :  { %4698 = vmatprep.subr.mxu1 %v4615_v4  ;;  %v12811_v4 = vand.u32 4294901760, %v66_v63 }
  0xfa   :  { %5155 = vmatmul.mubr.f32.vlgmr.msra.gmra.mrb[10].mxu0 %v12459_v7  ;;  %v12837_v17 = vsub.f32 %v66_v63, %v12811_v4 }
  0xfb   :  { %5166 = vmatpush1.msra.mxu0 %v5086_v3  ;;  %5229 = vmatprep.mubr.f32.mxu0 %v12408_v0  ;;  %v12808_v3 = vsub.s32 5, %v12715_v27 }
  0xfc   :  { %5239 = vmatprep.subr.mxu0 %v12659_v58 }
  0xfe   :  { %4690 = vmatmul.mubr.f32.vlgmr.msra.gmra.mrb[10].mxu1 %v12459_v7 }
  0xff   :  { %4701 = vmatpush1.msra.mxu1 %v12680_v6  ;;  %4764 = vmatprep.mubr.f32.mxu1 %v12408_v0  ;;  %v65_v6 = vld [vmem:[#allocation2 + $0xd0] sm:$0xff] }
 0x100   :  { %4774 = vmatprep.subr.mxu1 %v12664_v61  ;;  %v12830_v15 = vand.u32 4294901760, %v65_v6 }
 0x102   :  { %5232 = vmatmul.mubr.f32.vlgmr.msra.gmra.mrb[10].mxu0 %v12462_v11  ;;  %v12848_v26 = vsub.f32 %v65_v6, %v12830_v15 }
 0x103   :  { %5241 = vmatpush1.msra.mxu0 %v12666_v62  ;;  %5304 = vmatprep.mubr.f32.mxu0 %v12408_v0 }
 0x104   :  { %5317 = vmatprep.subr.mxu0 %v5081_v5  ;;  %v12813_v5 = vand.u32 4294901760, %v67_v1 }
 0x106   :  { %4767 = vmatmul.mubr.f32.vlgmr.msra.gmra.mrb[10].mxu1 %v12462_v11  ;;  %v12834_v16 = vsub.f32 %v67_v1, %v12813_v5 }
 0x107   :  { %4776 = vmatpush1.msra.mxu1 %v12671_v2  ;;  %4839 = vmatprep.mubr.f32.mxu1 %v12408_v0 }
 0x108   :  { %4852 = vmatprep.subr.mxu1 %v4616_v8 }
 0x10a   :  { %5308 = vmatmul.mubr.f32.vlgmr.msra.gmra.mrb[10].mxu0 %v12465_v14 }
 0x10b   :  { %5321 = vmatpush1.msra.mxu0 %v5087_v10  ;;  %5384 = vmatprep.mubr.f32.mxu0 %v12408_v0  ;;  %v12822_v10 = vsub.s32 2, %v12715_v27 }
 0x10c   :  { %5393 = vmatprep.subr.mxu0 %v12659_v58  ;;  %v5548_v58 = vand.u32 4294901760, %v5547_v53  ;;  %v69_v53 = vld [vmem:[#allocation2 + $0xf0] sm:$0xff] }
 0x10d   :  { %v113_v22 = vrot.slane %v12730_v33, %v12822_v10 }
 0x10e   :  { %4843 = vmatmul.mubr.f32.vlgmr.msra.gmra.mrb[10].mxu1 %v12465_v14 }
 0x10f   :  { %4856 = vmatpush1.msra.mxu1 %v4622_v12  ;;  %4919 = vmatprep.mubr.f32.mxu1 %v12408_v0  ;;  %v125_v12 = vrot.slane %v12730_v33, %v12808_v3 }
 0x110   :  { %4928 = vmatprep.subr.mxu1 %v12664_v61  ;;  %v68_v61 = vld [vmem:[#allocation2 + $0xe8] sm:$0xff] }
 0x111   :  { %v811_v39 = vpop.f32.mrb[0].mxu0 }
 0x112   :  { %v813_v40 = vpop.f32.mrb[1].mxu0  ;;  %5386 = vmatmul.mubr.f32.vlgmr.msra.gmra.mrb[10].mxu0 %v12459_v7 }
 0x113   :  { %5395 = vmatpush1.msra.mxu0 %v12666_v62  ;;  %5458 = vmatprep.mubr.f32.mxu0 %v12408_v0  ;;  %v12800_v62 = vand.u32 4294901760, %v68_v61 }
 0x114   :  { %5932 = vmatprep.subr.mxu0 %v12712_v24 }
 0x115   :  { %v583_v47 = vpop.f32.mrb[0].mxu1  ;;  %v12816_v8 = vsub.f32 %v68_v61, %v12800_v62 }
 0x116   :  { %v12055_v48 = vadd.f32 %v583_v47, %v105_v41  ;;  %v585_v49 = vpop.f32.mrb[1].mxu1  ;;  %4921 = vmatmul.mubr.f32.vlgmr.msra.gmra.mrb[10].mxu1 %v12459_v7 }
 0x117   :  { %v12057_v50 = vadd.f32 %v585_v49, %v109_v42  ;;  %4930 = vmatpush1.msra.mxu1 %v12671_v2  ;;  %4993 = vmatprep.mubr.f32.mxu1 %v12408_v0  ;;  %v12804_v2 = vsub.s32 4, %v12715_v27  ;;  %v6941_v18 = vand.u32 4294901760, %v12816_v8  ;;  %v71_v49 = vld [vmem:[#allocation2 + $0x100] sm:$0xff] }
 0x118   :  { %v12056_v52 = vadd.f32 %v12055_v48, %v811_v39  ;;  %5467 = vmatprep.subr.mxu1 %v12719_v28  ;;  %v6482_v39 = vand.u32 4294901760, %v12848_v26  ;;  %v70_v48 = vld [vmem:[#allocation2 + $0xf8] sm:$0xff] }
 0x119   :  { %v12058_v56 = vadd.f32 %v12057_v50, %v813_v40  ;;  %v121_v9 = vrot.slane %v12730_v33, %v12804_v2  ;;  %v6942_v30 = vsub.f32 %v12816_v8, %v6941_v18  ;;  %v12903_v50 = vld [vmem:[#allocation4 + $0x8] sm:$0xff] }
 0x11a   :  { %11957 = vst [vmem:[%s13462_s3] sm:$0xff] %v12056_v52  ;;  %5460 = vmatmul.mubr.f32.vlgmr.msra.gmra.mrb[10].mxu0 %v12459_v7  ;;  %v12909_v52 = vand.u32 4294901760, %v71_v49  ;;  %v137_v55 = vrot.slane %v12903_v50, %v12728_v32  ;;  %v141_v57 = vrot.slane %v12903_v50, %v12734_v34 }
 0x11b   :  { %11958 = vst [vmem:[%s13462_s3 + $0x8] sm:$0xff] %v12058_v56  ;;  %5934 = vmatpush1.msra.mxu0 %v12721_v29  ;;  %5997 = vmatprep.mubr.f32.mxu0 %v12408_v0  ;;  %v6943_v41 = vand.u32 4294901760, %v6942_v30  ;;  %v12918_v56 = vsub.s32 6, %v12715_v27  ;;  %v76_v30 = vld [vmem:[#allocation2 + $0x128] sm:$0xff] }
 0x11c   :  { %6014 = vmatprep.subr.mxu0 %v6013_v54 }
 0x11e   :  { %4995 = vmatmul.mubr.f32.vlgmr.msra.gmra.mrb[10].mxu1 %v12459_v7  ;;  %6003 = vmatmul.mubr.f32.vlgmr.msra.gmra.mrb[12].mxu0 %v12473_v23 }
 0x11f   :  { %5469 = vmatpush1.msra.mxu1 %v12736_v35  ;;  %5532 = vmatprep.mubr.f32.mxu1 %v12408_v0 }
 0x120   :  { %5549 = vmatprep.subr.mxu1 %v5548_v58  ;;  %6020 = vmatpush1.msra.mxu0 %v6019_v59  ;;  %v12924_v58 = vsub.s32 7, %v12715_v27  ;;  %v12926_v59 = vand.u32 4294901760, %v69_v53  ;;  %v129_v27 = vrot.slane %v12730_v33, %v12918_v56 }
 0x121   :  { %6083 = vmatprep.mubr.f32.mxu0 %v12408_v0  ;;  %6093 = vmatprep.subr.mxu0 %v12724_v31  ;;  %v6947_v31 = vand.u32 4294901760, %v12834_v16 }
 0x122   :  { %5538 = vmatmul.mubr.f32.vlgmr.msra.gmra.mrb[12].mxu1 %v12473_v23 }
 0x123   :  { %5555 = vmatpush1.msra.mxu1 %v5554_v60  ;;  %5618 = vmatprep.mubr.f32.mxu1 %v12408_v0  ;;  %v6948_v42 = vsub.f32 %v12834_v16, %v6947_v31  ;;  %v12930_v60 = vsub.f32 %v71_v49, %v12909_v52  ;;  %v145_v49 = vrot.slane %v12903_v50, %v12822_v10 }
 0x124   :  { %5628 = vmatprep.subr.mxu1 %v12743_v37 }
 0x126   :  { %6085 = vmatmul.mubr.f32.vlgmr.msra.gmra.mrb[12].mxu0 %v12459_v7 }
 0x127   :  { %6096 = vmatpush1.msra.mxu0 %v12740_v36  ;;  %6159 = vmatprep.mubr.f32.mxu0 %v12408_v0 }
 0x128   :  { %6169 = vmatprep.subr.mxu0 %v12712_v24 }
 0x12a   :  { %5620 = vmatmul.mubr.f32.vlgmr.msra.gmra.mrb[12].mxu1 %v12459_v7 }
 0x12b   :  { %5631 = vmatpush1.msra.mxu1 %v12754_v43  ;;  %5694 = vmatprep.mubr.f32.mxu1 %v12408_v0 }
 0x12c   :  { %5704 = vmatprep.subr.mxu1 %v12719_v28 }
 0x12e   :  { %6162 = vmatmul.mubr.f32.vlgmr.msra.gmra.mrb[12].mxu0 %v12462_v11 }
 0x12f   :  { %6171 = vmatpush1.msra.mxu0 %v12721_v29  ;;  %6234 = vmatprep.mubr.f32.mxu0 %v12408_v0 }
 0x130   :  { %6247 = vmatprep.subr.mxu0 %v6011_v38 }
 0x132   :  { %5697 = vmatmul.mubr.f32.vlgmr.msra.gmra.mrb[12].mxu1 %v12462_v11 }
 0x133   :  { %5706 = vmatpush1.msra.mxu1 %v12736_v35  ;;  %5769 = vmatprep.mubr.f32.mxu1 %v12408_v0 }
 0x134   :  { %5782 = vmatprep.subr.mxu1 %v5546_v44  ;;  %v6949_v44 = vand.u32 4294901760, %v6948_v42  ;;  %v157_v42 = vrot.slane %v12903_v50, %v12808_v3 }
 0x136   :  { %6238 = vmatmul.mubr.f32.vlgmr.msra.gmra.mrb[12].mxu0 %v12465_v14 }
 0x137   :  { %6251 = vmatpush1.msra.mxu0 %v6017_v46  ;;  %6314 = vmatprep.mubr.f32.mxu0 %v12408_v0  ;;  %v72_v46 = vld [vmem:[#allocation2 + $0x108] sm:$0xff] }
 0x138   :  { %6323 = vmatprep.subr.mxu0 %v12712_v24  ;;  %v12900_v47 = vand.u32 4294901760, %v72_v46 }
 0x13a   :  { %5773 = vmatmul.mubr.f32.vlgmr.msra.gmra.mrb[12].mxu1 %v12465_v14  ;;  %v12912_v54 = vsub.f32 %v72_v46, %v12900_v47 }
 0x13b   :  { %5786 = vmatpush1.msra.mxu1 %v5552_v51  ;;  %5849 = vmatprep.mubr.f32.mxu1 %v12408_v0  ;;  %v12907_v51 = vand.u32 4294901760, %v70_v48 }
 0x13c   :  { %5858 = vmatprep.subr.mxu1 %v12719_v28  ;;  %v6476_v28 = vand.u32 4294901760, %v12837_v17 }
 0x13d   :  { %v1741_v19 = vpop.f32.mrb[2].mxu0  ;;  %v12933_v61 = vsub.f32 %v70_v48, %v12907_v51 }
 0x13e   :  { %v12061_v20 = vadd.f32 %v1741_v19, %v121_v9  ;;  %v1743_v21 = vpop.f32.mrb[3].mxu0  ;;  %6316 = vmatmul.mubr.f32.vlgmr.msra.gmra.mrb[12].mxu0 %v12459_v7  ;;  %v6477_v40 = vsub.f32 %v12837_v17, %v6476_v28  ;;  %v12944_v9 = vsub.f32 %v69_v53, %v12926_v59 }
 0x13f   :  { %v12062_v24 = vadd.f32 %v1743_v21, %v125_v12  ;;  %6325 = vmatpush1.msra.mxu0 %v12721_v29  ;;  %6388 = vmatprep.mubr.f32.mxu0 %v12408_v0  ;;  %v7406_v12 = vand.u32 4294901760, %v12933_v61 }
 0x140   :  { %11961 = vst [vmem:[%s13462_s3 + $0x20] sm:$0xff] %v12061_v20  ;;  %6862 = vmatprep.subr.mxu0 %v12800_v62  ;;  %v6478_v43 = vand.u32 4294901760, %v6477_v40  ;;  %v7412_v20 = vand.u32 4294901760, %v12944_v9 }
 0x141   :  { %11962 = vst [vmem:[%s13462_s3 + $0x28] sm:$0xff] %v12062_v24  ;;  %v1276_v29 = vpop.f32.mrb[2].mxu1  ;;  %v7407_v21 = vsub.f32 %v12933_v61, %v7406_v12 }
 0x142   :  { %v12059_v36 = vadd.f32 %v1276_v29, %v113_v22  ;;  %v1278_v37 = vpop.f32.mrb[3].mxu1  ;;  %5851 = vmatmul.mubr.f32.vlgmr.msra.gmra.mrb[12].mxu1 %v12459_v7  ;;  %v74_v29 = vld [vmem:[#allocation2 + $0x118] sm:$0xff] }
 0x143   :  { %v12060_v38 = vadd.f32 %v1278_v37, %v117_v25  ;;  %5860 = vmatpush1.msra.mxu1 %v12736_v35  ;;  %5923 = vmatprep.mubr.f32.mxu1 %v12408_v0  ;;  %v6483_v35 = vsub.f32 %v12848_v26, %v6482_v39  ;;  %v7408_v25 = vand.u32 4294901760, %v7407_v21  ;;  %v13001_v37 = vand.u32 4294901760, %v74_v29  ;;  %v77_v21 = vld [vmem:[#allocation2 + $0x130] sm:$0xff] }
 0x144   :  { %11959 = vst [vmem:[%s13462_s3 + $0x10] sm:$0xff] %v12059_v36  ;;  %6397 = vmatprep.subr.mxu1 %v12811_v4  ;;  %v75_v36 = vld [vmem:[#allocation2 + $0x120] sm:$0xff] }
 0x145   :  { %11960 = vst [vmem:[%s13462_s3 + $0x18] sm:$0xff] %v12060_v38  ;;  %v6484_v45 = vand.u32 4294901760, %v6483_v35  ;;  %v13003_v38 = vand.u32 4294901760, %v75_v36 }
 0x146   :  { %6390 = vmatmul.mubr.f32.vlgmr.msra.gmra.mrb[12].mxu0 %v12459_v7 }
 0x147   :  { %6864 = vmatpush1.msra.mxu0 %v12813_v5  ;;  %6927 = vmatprep.mubr.f32.mxu0 %v12408_v0 }
 0x148   :  { %6944 = vmatprep.subr.mxu0 %v6943_v41  ;;  %v153_v41 = vrot.slane %v12903_v50, %v12804_v2 }
 0x14a   :  { %5925 = vmatmul.mubr.f32.vlgmr.msra.gmra.mrb[12].mxu1 %v12459_v7  ;;  %6933 = vmatmul.mubr.f32.vlgmr.msra.gmra.mrb[14].mxu0 %v12473_v23 }
 0x14b   :  { %6399 = vmatpush1.msra.mxu1 %v12830_v15  ;;  %6462 = vmatprep.mubr.f32.mxu1 %v12408_v0 }
 0x14c   :  { %6479 = vmatprep.subr.mxu1 %v6478_v43  ;;  %6950 = vmatpush1.msra.mxu0 %v6949_v44  ;;  %v13018_v43 = vsub.f32 %v75_v36, %v13003_v38  ;;  %v13021_v44 = vsub.f32 %v74_v29, %v13001_v37 }
 0x14d   :  { %7013 = vmatprep.mubr.f32.mxu0 %v12408_v0  ;;  %7023 = vmatprep.subr.mxu0 %v12816_v8 }
 0x14e   :  { %6468 = vmatmul.mubr.f32.vlgmr.msra.gmra.mrb[14].mxu1 %v12473_v23 }
 0x14f   :  { %6485 = vmatpush1.msra.mxu1 %v6484_v45  ;;  %6548 = vmatprep.mubr.f32.mxu1 %v12408_v0 }
 0x150   :  { %6558 = vmatprep.subr.mxu1 %v12837_v17  ;;  %v7877_v17 = vand.u32 4294901760, %v12930_v60 }
 0x152   :  { %7015 = vmatmul.mubr.f32.vlgmr.msra.gmra.mrb[14].mxu0 %v12459_v7  ;;  %v7878_v24 = vsub.f32 %v12930_v60, %v7877_v17 }
 0x153   :  { %7026 = vmatpush1.msra.mxu0 %v12834_v16  ;;  %7089 = vmatprep.mubr.f32.mxu0 %v12408_v0 }
 0x154   :  { %7099 = vmatprep.subr.mxu0 %v12800_v62 }
 0x156   :  { %6550 = vmatmul.mubr.f32.vlgmr.msra.gmra.mrb[14].mxu1 %v12459_v7 }
 0x157   :  { %6561 = vmatpush1.msra.mxu1 %v12848_v26  ;;  %6624 = vmatprep.mubr.f32.mxu1 %v12408_v0  ;;  %v7879_v26 = vand.u32 4294901760, %v7878_v24 }
 0x158   :  { %6634 = vmatprep.subr.mxu1 %v12811_v4 }
 0x15a   :  { %7092 = vmatmul.mubr.f32.vlgmr.msra.gmra.mrb[14].mxu0 %v12462_v11 }
 0x15b   :  { %7101 = vmatpush1.msra.mxu0 %v12813_v5  ;;  %7164 = vmatprep.mubr.f32.mxu0 %v12408_v0 }
 0x15c   :  { %7177 = vmatprep.subr.mxu0 %v6941_v18 }
 0x15e   :  { %6627 = vmatmul.mubr.f32.vlgmr.msra.gmra.mrb[14].mxu1 %v12462_v11 }
 0x15f   :  { %6636 = vmatpush1.msra.mxu1 %v12830_v15  ;;  %6699 = vmatprep.mubr.f32.mxu1 %v12408_v0 }
 0x160   :  { %6712 = vmatprep.subr.mxu1 %v6476_v28 }
 0x162   :  { %7168 = vmatmul.mubr.f32.vlgmr.msra.gmra.mrb[14].mxu0 %v12465_v14 }
 0x163   :  { %7181 = vmatpush1.msra.mxu0 %v6947_v31  ;;  %7244 = vmatprep.mubr.f32.mxu0 %v12408_v0  ;;  %v12996_v31 = vand.u32 4294901760, %v76_v30 }
 0x164   :  { %7253 = vmatprep.subr.mxu0 %v12800_v62  ;;  %v7871_v62 = vand.u32 4294901760, %v12912_v54 }
 0x165   :  { %v13006_v40 = vsub.f32 %v76_v30, %v12996_v31 }
 0x166   :  { %6703 = vmatmul.mubr.f32.vlgmr.msra.gmra.mrb[14].mxu1 %v12465_v14  ;;  %v7872_v16 = vsub.f32 %v12912_v54, %v7871_v62 }
 0x167   :  { %6716 = vmatpush1.msra.mxu1 %v6482_v39  ;;  %6779 = vmatprep.mubr.f32.mxu1 %v12408_v0  ;;  %v73_v39 = vld [vmem:[#allocation2 + $0x110] sm:$0xff]  ;;  %v8801_v45 = vand.u32 4294901760, %v13006_v40 }
 0x168   :  { %6788 = vmatprep.subr.mxu1 %v12811_v4  ;;  %v133_v4 = vrot.slane %v12730_v33, %v12924_v58  ;;  %v7873_v22 = vand.u32 4294901760, %v7872_v16  ;;  %v13014_v35 = vand.u32 4294901760, %v73_v39  ;;  %v80_v16 = vld [vmem:[#allocation2 + $0x148] sm:$0xff] }
 0x169   :  { %v2671_v63 = vpop.f32.mrb[4].mxu0 }
 0x16a   :  { %v12065_v1 = vadd.f32 %v2671_v63, %v137_v55  ;;  %v2673_v6 = vpop.f32.mrb[5].mxu0  ;;  %7246 = vmatmul.mubr.f32.vlgmr.msra.gmra.mrb[14].mxu0 %v12459_v7  ;;  %v8336_v55 = vand.u32 4294901760, %v13021_v44 }
 0x16b   :  { %v12066_v8 = vadd.f32 %v2673_v6, %v141_v57  ;;  %7255 = vmatpush1.msra.mxu0 %v12813_v5  ;;  %7318 = vmatprep.mubr.f32.mxu0 %v12408_v0  ;;  %v8802_v57 = vsub.f32 %v13006_v40, %v8801_v45 }
 0x16c   :  { %11965 = vst [vmem:[%s13462_s3 + $0x40] sm:$0xff] %v12065_v1  ;;  %7792 = vmatprep.subr.mxu0 %v12900_v47  ;;  %v8337_v6 = vsub.f32 %v13021_v44, %v8336_v55 }
 0x16d   :  { %11966 = vst [vmem:[%s13462_s3 + $0x48] sm:$0xff] %v12066_v8  ;;  %v2206_v33 = vpop.f32.mrb[4].mxu1 }
 0x16e   :  { %v12063_v5 = vadd.f32 %v2206_v33, %v129_v27  ;;  %v2208_v18 = vpop.f32.mrb[5].mxu1  ;;  %6781 = vmatmul.mubr.f32.vlgmr.msra.gmra.mrb[14].mxu1 %v12459_v7  ;;  %v8803_v27 = vand.u32 4294901760, %v8802_v57  ;;  %v78_v33 = vld [vmem:[#allocation2 + $0x138] sm:$0xff]  ;;  %v84_v57 = vld [vmem:[#allocation2 + $0x168] sm:$0xff] }
 0x16f   :  { %v12064_v19 = vadd.f32 %v2208_v18, %v133_v4  ;;  %6790 = vmatpush1.msra.mxu1 %v12830_v15  ;;  %6853 = vmatprep.mubr.f32.mxu1 %v12408_v0  ;;  %v7413_v15 = vsub.f32 %v12944_v9, %v7412_v20  ;;  %v8338_v4 = vand.u32 4294901760, %v8337_v6  ;;  %v13087_v18 = vld [vmem:[#allocation4 + $0x10] sm:$0xff] }
 0x170   :  { %11963 = vst [vmem:[%s13462_s3 + $0x30] sm:$0xff] %v12063_v5  ;;  %7327 = vmatprep.subr.mxu1 %v12907_v51  ;;  %v79_v5 = vld [vmem:[#allocation2 + $0x140] sm:$0xff]  ;;  %v169_v24 = vrot.slane %v13087_v18, %v12728_v32 }
 0x171   :  { %11964 = vst [vmem:[%s13462_s3 + $0x38] sm:$0xff] %v12064_v19  ;;  %v7414_v28 = vand.u32 4294901760, %v7413_v15  ;;  %v13091_v19 = vand.u32 4294901760, %v78_v33  ;;  %v173_v15 = vrot.slane %v13087_v18, %v12734_v34 }
 0x172   :  { %7320 = vmatmul.mubr.f32.vlgmr.msra.gmra.mrb[14].mxu0 %v12459_v7 }
 0x173   :  { %7794 = vmatpush1.msra.mxu0 %v12909_v52  ;;  %7857 = vmatprep.mubr.f32.mxu0 %v12408_v0 }
 0x174   :  { %7874 = vmatprep.subr.mxu0 %v7873_v22 }
 0x176   :  { %6855 = vmatmul.mubr.f32.vlgmr.msra.gmra.mrb[14].mxu1 %v12459_v7  ;;  %7863 = vmatmul.mubr.f32.vlgmr.msra.gmra.mrb[16].mxu0 %v12473_v23 }
 0x177   :  { %7329 = vmatpush1.msra.mxu1 %v12926_v59  ;;  %7392 = vmatprep.mubr.f32.mxu1 %v12408_v0 }
 0x178   :  { %7409 = vmatprep.subr.mxu1 %v7408_v25  ;;  %7880 = vmatpush1.msra.mxu0 %v7879_v26  ;;  %v13104_v25 = vand.u32 4294901760, %v77_v21 }
 0x179   :  { %7943 = vmatprep.mubr.f32.mxu0 %v12408_v0  ;;  %7953 = vmatprep.subr.mxu0 %v12912_v54  ;;  %v13032_v54 = vsub.f32 %v73_v39, %v13014_v35  ;;  %v161_v39 = vrot.slane %v12903_v50, %v12918_v56 }
 0x17a   :  { %7398 = vmatmul.mubr.f32.vlgmr.msra.gmra.mrb[16].mxu1 %v12473_v23 }
 0x17b   :  { %7415 = vmatpush1.msra.mxu1 %v7414_v28  ;;  %7478 = vmatprep.mubr.f32.mxu1 %v12408_v0  ;;  %v8342_v1 = vand.u32 4294901760, %v13032_v54  ;;  %v13111_v28 = vsub.f32 %v78_v33, %v13091_v19 }
 0x17c   :  { %7488 = vmatprep.subr.mxu1 %v12933_v61 }
 0x17e   :  { %7945 = vmatmul.mubr.f32.vlgmr.msra.gmra.mrb[16].mxu0 %v12459_v7 }
 0x17f   :  { %7956 = vmatpush1.msra.mxu0 %v12930_v60  ;;  %8019 = vmatprep.mubr.f32.mxu0 %v12408_v0  ;;  %v8807_v60 = vand.u32 4294901760, %v13018_v43 }
 0x180   :  { %8029 = vmatprep.subr.mxu0 %v12900_v47 }
 0x181   :  { %v8808_v8 = vsub.f32 %v13018_v43, %v8807_v60 }
 0x182   :  { %7480 = vmatmul.mubr.f32.vlgmr.msra.gmra.mrb[16].mxu1 %v12459_v7 }
 0x183   :  { %7491 = vmatpush1.msra.mxu1 %v12944_v9  ;;  %7554 = vmatprep.mubr.f32.mxu1 %v12408_v0  ;;  %v8809_v9 = vand.u32 4294901760, %v8808_v8  ;;  %v189_v8 = vrot.slane %v13087_v18, %v12808_v3 }
 0x184   :  { %7564 = vmatprep.subr.mxu1 %v12907_v51 }
 0x186   :  { %8022 = vmatmul.mubr.f32.vlgmr.msra.gmra.mrb[16].mxu0 %v12462_v11 }
 0x187   :  { %8031 = vmatpush1.msra.mxu0 %v12909_v52  ;;  %8094 = vmatprep.mubr.f32.mxu0 %v12408_v0 }
 0x188   :  { %8107 = vmatprep.subr.mxu0 %v7871_v62 }
 0x18a   :  { %7557 = vmatmul.mubr.f32.vlgmr.msra.gmra.mrb[16].mxu1 %v12462_v11 }
 0x18b   :  { %7566 = vmatpush1.msra.mxu1 %v12926_v59  ;;  %7629 = vmatprep.mubr.f32.mxu1 %v12408_v0 }
 0x18c   :  { %7642 = vmatprep.subr.mxu1 %v7406_v12 }
 0x18e   :  { %8098 = vmatmul.mubr.f32.vlgmr.msra.gmra.mrb[16].mxu0 %v12465_v14 }
 0x18f   :  { %8111 = vmatpush1.msra.mxu0 %v7877_v17  ;;  %8174 = vmatprep.mubr.f32.mxu0 %v12408_v0  ;;  %v13084_v17 = vand.u32 4294901760, %v80_v16 }
 0x190   :  { %8183 = vmatprep.subr.mxu0 %v12900_v47 }
 0x191   :  { %v13096_v22 = vsub.f32 %v80_v16, %v13084_v17 }
 0x192   :  { %7633 = vmatmul.mubr.f32.vlgmr.msra.gmra.mrb[16].mxu1 %v12465_v14 }
 0x193   :  { %7646 = vmatpush1.msra.mxu1 %v7412_v20  ;;  %7709 = vmatprep.mubr.f32.mxu1 %v12408_v0  ;;  %v13093_v20 = vand.u32 4294901760, %v79_v5  ;;  %v9731_v30 = vand.u32 4294901760, %v13096_v22 }
 0x194   :  { %7718 = vmatprep.subr.mxu1 %v12907_v51  ;;  %v149_v51 = vrot.slane %v12903_v50, %v12828_v13 }
 0x195   :  { %v3601_v46 = vpop.f32.mrb[6].mxu0  ;;  %v13108_v26 = vsub.f32 %v79_v5, %v13093_v20  ;;  %v177_v5 = vrot.slane %v13087_v18, %v12822_v10 }
 0x196   :  { %v12069_v47 = vadd.f32 %v3601_v46, %v153_v41  ;;  %v3603_v48 = vpop.f32.mrb[7].mxu0  ;;  %8176 = vmatmul.mubr.f32.vlgmr.msra.gmra.mrb[16].mxu0 %v12459_v7  ;;  %v13122_v41 = vsub.f32 %v77_v21, %v13104_v25 }
 0x197   :  { %v12070_v53 = vadd.f32 %v3603_v48, %v157_v42  ;;  %8185 = vmatpush1.msra.mxu0 %v12909_v52  ;;  %8248 = vmatprep.mubr.f32.mxu0 %v12408_v0  ;;  %v9266_v42 = vand.u32 4294901760, %v13111_v28 }
 0x198   :  { %11969 = vst [vmem:[%s13462_s3 + $0x60] sm:$0xff] %v12069_v47  ;;  %8722 = vmatprep.subr.mxu0 %v12996_v31  ;;  %v9272_v47 = vand.u32 4294901760, %v13122_v41 }
 0x199   :  { %11970 = vst [vmem:[%s13462_s3 + $0x68] sm:$0xff] %v12070_v53  ;;  %v3136_v52 = vpop.f32.mrb[6].mxu1  ;;  %v9267_v48 = vsub.f32 %v13111_v28, %v9266_v42 }
 0x19a   :  { %v12067_v61 = vadd.f32 %v3136_v52, %v145_v49  ;;  %v3138_v62 = vpop.f32.mrb[7].mxu1  ;;  %7711 = vmatmul.mubr.f32.vlgmr.msra.gmra.mrb[16].mxu1 %v12459_v7  ;;  %v82_v52 = vld [vmem:[#allocation2 + $0x158] sm:$0xff] }
 0x19b   :  { %v12068_v63 = vadd.f32 %v3138_v62, %v149_v51  ;;  %7720 = vmatpush1.msra.mxu1 %v12926_v59  ;;  %7783 = vmatprep.mubr.f32.mxu1 %v12408_v0  ;;  %v8343_v59 = vsub.f32 %v13032_v54, %v8342_v1  ;;  %v9268_v51 = vand.u32 4294901760, %v9267_v48  ;;  %v13179_v62 = vand.u32 4294901760, %v82_v52 }
 0x19c   :  { %11967 = vst [vmem:[%s13462_s3 + $0x50] sm:$0xff] %v12067_v61  ;;  %8257 = vmatprep.subr.mxu1 %v13001_v37  ;;  %v83_v61 = vld [vmem:[#allocation2 + $0x160] sm:$0xff] }
 0x19d   :  { %11968 = vst [vmem:[%s13462_s3 + $0x58] sm:$0xff] %v12068_v63  ;;  %v8344_v12 = vand.u32 4294901760, %v8343_v59  ;;  %v13181_v63 = vand.u32 4294901760, %v83_v61 }
 0x19e   :  { %8250 = vmatmul.mubr.f32.vlgmr.msra.gmra.mrb[16].mxu0 %v12459_v7 }
 0x19f   :  { %8724 = vmatpush1.msra.mxu0 %v13003_v38  ;;  %8787 = vmatprep.mubr.f32.mxu0 %v12408_v0 }
 0x1a0   :  { %8804 = vmatprep.subr.mxu0 %v8803_v27  ;;  %v185_v27 = vrot.slane %v13087_v18, %v12804_v2 }
 0x1a2   :  { %7785 = vmatmul.mubr.f32.vlgmr.msra.gmra.mrb[16].mxu1 %v12459_v7  ;;  %8793 = vmatmul.mubr.f32.vlgmr.msra.gmra.mrb[18].mxu0 %v12473_v23 }
 0x1a3   :  { %8259 = vmatpush1.msra.mxu1 %v13014_v35  ;;  %8322 = vmatprep.mubr.f32.mxu1 %v12408_v0 }
 0x1a4   :  { %8339 = vmatprep.subr.mxu1 %v8338_v4  ;;  %8810 = vmatpush1.msra.mxu0 %v8809_v9  ;;  %v13196_v4 = vsub.f32 %v83_v61, %v13181_v63  ;;  %v13199_v9 = vsub.f32 %v82_v52, %v13179_v62  ;;  %v197_v52 = vrot.slane %v13087_v18, %v12924_v58 }
 0x1a5   :  { %8873 = vmatprep.mubr.f32.mxu0 %v12408_v0  ;;  %8883 = vmatprep.subr.mxu0 %v13006_v40 }
 0x1a6   :  { %8328 = vmatmul.mubr.f32.vlgmr.msra.gmra.mrb[18].mxu1 %v12473_v23 }
 0x1a7   :  { %8345 = vmatpush1.msra.mxu1 %v8344_v12  ;;  %8408 = vmatprep.mubr.f32.mxu1 %v12408_v0 }
 0x1a8   :  { %8418 = vmatprep.subr.mxu1 %v13021_v44  ;;  %v9737_v44 = vand.u32 4294901760, %v13108_v26 }
 0x1aa   :  { %8875 = vmatmul.mubr.f32.vlgmr.msra.gmra.mrb[18].mxu0 %v12459_v7  ;;  %v9738_v53 = vsub.f32 %v13108_v26, %v9737_v44 }
 0x1ab   :  { %8886 = vmatpush1.msra.mxu0 %v13018_v43  ;;  %8949 = vmatprep.mubr.f32.mxu0 %v12408_v0  ;;  %v9732_v43 = vsub.f32 %v13096_v22, %v9731_v30 }
 0x1ac   :  { %8959 = vmatprep.subr.mxu0 %v12996_v31 }
 0x1ad   :  { %v9733_v49 = vand.u32 4294901760, %v9732_v43  ;;  %v86_v43 = vld [vmem:[#allocation2 + $0x178] sm:$0xff] }
 0x1ae   :  { %8410 = vmatmul.mubr.f32.vlgmr.msra.gmra.mrb[18].mxu1 %v12459_v7 }
 0x1af   :  { %8421 = vmatpush1.msra.mxu1 %v13032_v54  ;;  %8484 = vmatprep.mubr.f32.mxu1 %v12408_v0  ;;  %v9739_v54 = vand.u32 4294901760, %v9738_v53 }
 0x1b0   :  { %8494 = vmatprep.subr.mxu1 %v13001_v37 }
 0x1b2   :  { %8952 = vmatmul.mubr.f32.vlgmr.msra.gmra.mrb[18].mxu0 %v12462_v11 }
 0x1b3   :  { %8961 = vmatpush1.msra.mxu0 %v13003_v38  ;;  %9024 = vmatprep.mubr.f32.mxu0 %v12408_v0 }
 0x1b4   :  { %9037 = vmatprep.subr.mxu0 %v8801_v45 }
 0x1b6   :  { %8487 = vmatmul.mubr.f32.vlgmr.msra.gmra.mrb[18].mxu1 %v12462_v11 }
 0x1b7   :  { %8496 = vmatpush1.msra.mxu1 %v13014_v35  ;;  %8559 = vmatprep.mubr.f32.mxu1 %v12408_v0 }
 0x1b8   :  { %8572 = vmatprep.subr.mxu1 %v8336_v55 }
 0x1ba   :  { %9028 = vmatmul.mubr.f32.vlgmr.msra.gmra.mrb[18].mxu0 %v12465_v14 }
 0x1bb   :  { %9041 = vmatpush1.msra.mxu0 %v8807_v60  ;;  %9104 = vmatprep.mubr.f32.mxu0 %v12408_v0  ;;  %v13174_v60 = vand.u32 4294901760, %v84_v57 }
 0x1bc   :  { %9113 = vmatprep.subr.mxu0 %v12996_v31 }
 0x1bd   :  { %v13184_v6 = vsub.f32 %v84_v57, %v13174_v60  ;;  %v193_v57 = vrot.slane %v13087_v18, %v12918_v56 }
 0x1be   :  { %8563 = vmatmul.mubr.f32.vlgmr.msra.gmra.mrb[18].mxu1 %v12465_v14 }
 0x1bf   :  { %8576 = vmatpush1.msra.mxu1 %v8342_v1  ;;  %8639 = vmatprep.mubr.f32.mxu1 %v12408_v0  ;;  %v81_v1 = vld [vmem:[#allocation2 + $0x150] sm:$0xff]  ;;  %v10661_v12 = vand.u32 4294901760, %v13184_v6 }
 0x1c0   :  { %8648 = vmatprep.subr.mxu1 %v13001_v37  ;;  %v165_v37 = vrot.slane %v12903_v50, %v12924_v58  ;;  %v13192_v59 = vand.u32 4294901760, %v81_v1 }
 0x1c1   :  { %v4531_v31 = vpop.f32.mrb[8].mxu0 }
 0x1c2   :  { %v12073_v29 = vadd.f32 %v4531_v31, %v169_v24  ;;  %v4533_v36 = vpop.f32.mrb[9].mxu0  ;;  %9106 = vmatmul.mubr.f32.vlgmr.msra.gmra.mrb[18].mxu0 %v12459_v7  ;;  %v10196_v24 = vand.u32 4294901760, %v13199_v9 }
 0x1c3   :  { %v12074_v40 = vadd.f32 %v4533_v36, %v173_v15  ;;  %9115 = vmatpush1.msra.mxu0 %v13003_v38  ;;  %9178 = vmatprep.mubr.f32.mxu0 %v12408_v0  ;;  %v10662_v15 = vsub.f32 %v13184_v6, %v10661_v12 }
 0x1c4   :  { %11973 = vst [vmem:[%s13462_s3 + $0x80] sm:$0xff] %v12073_v29  ;;  %9652 = vmatprep.subr.mxu0 %v13084_v17  ;;  %v10197_v36 = vsub.f32 %v13199_v9, %v10196_v24 }
 0x1c5   :  { %11974 = vst [vmem:[%s13462_s3 + $0x88] sm:$0xff] %v12074_v40  ;;  %v4066_v50 = vpop.f32.mrb[8].mxu1 }
 0x1c6   :  { %v12071_v38 = vadd.f32 %v4066_v50, %v161_v39  ;;  %v4068_v45 = vpop.f32.mrb[9].mxu1  ;;  %8641 = vmatmul.mubr.f32.vlgmr.msra.gmra.mrb[18].mxu1 %v12459_v7  ;;  %v10663_v39 = vand.u32 4294901760, %v10662_v15  ;;  %v13263_v50 = vld [vmem:[#allocation4 + $0x18] sm:$0xff] }
 0x1c7   :  { %v12072_v46 = vadd.f32 %v4068_v45, %v165_v37  ;;  %8650 = vmatpush1.msra.mxu1 %v13014_v35  ;;  %8713 = vmatprep.mubr.f32.mxu1 %v12408_v0  ;;  %v9273_v35 = vsub.f32 %v13122_v41, %v9272_v47  ;;  %v10198_v37 = vand.u32 4294901760, %v10197_v36  ;;  %v205_v48 = vrot.slane %v13263_v50, %v12734_v34 }
 0x1c8   :  { %11971 = vst [vmem:[%s13462_s3 + $0x70] sm:$0xff] %v12071_v38  ;;  %9187 = vmatprep.subr.mxu1 %v13091_v19  ;;  %v13267_v38 = vand.u32 4294901760, %v86_v43 }
 0x1c9   :  { %11972 = vst [vmem:[%s13462_s3 + $0x78] sm:$0xff] %v12072_v46  ;;  %v9274_v55 = vand.u32 4294901760, %v9273_v35  ;;  %v85_v46 = vld [vmem:[#allocation2 + $0x170] sm:$0xff] }
 0x1ca   :  { %9180 = vmatmul.mubr.f32.vlgmr.msra.gmra.mrb[18].mxu0 %v12459_v7  ;;  %v13284_v35 = vsub.f32 %v86_v43, %v13267_v38 }
 0x1cb   :  { %9654 = vmatpush1.msra.mxu0 %v13093_v20  ;;  %9717 = vmatprep.mubr.f32.mxu0 %v12408_v0 }
 0x1cc   :  { %9734 = vmatprep.subr.mxu0 %v9733_v49  ;;  %v13277_v49 = vand.u32 4294901760, %v85_v46 }
 0x1ce   :  { %8715 = vmatmul.mubr.f32.vlgmr.msra.gmra.mrb[18].mxu1 %v12459_v7  ;;  %9723 = vmatmul.mubr.f32.vlgmr.msra.gmra.mrb[20].mxu0 %v12473_v23  ;;  %v11131_v61 = vsub.f32 %v85_v46, %v13277_v49 }
 0x1cf   :  { %9189 = vmatpush1.msra.mxu1 %v13104_v25  ;;  %9252 = vmatprep.mubr.f32.mxu1 %v12408_v0 }
 0x1d0   :  { %9269 = vmatprep.subr.mxu1 %v9268_v51  ;;  %9740 = vmatpush1.msra.mxu0 %v9739_v54 }
 0x1d1   :  { %9803 = vmatprep.mubr.f32.mxu0 %v12408_v0  ;;  %9813 = vmatprep.subr.mxu0 %v13096_v22  ;;  %v13210_v22 = vsub.f32 %v81_v1, %v13192_v59 }
 0x1d2   :  { %9258 = vmatmul.mubr.f32.vlgmr.msra.gmra.mrb[20].mxu1 %v12473_v23 }
 0x1d3   :  { %9275 = vmatpush1.msra.mxu1 %v9274_v55  ;;  %9338 = vmatprep.mubr.f32.mxu1 %v12408_v0  ;;  %v10202_v29 = vand.u32 4294901760, %v13210_v22 }
 0x1d4   :  { %9348 = vmatprep.subr.mxu1 %v13111_v28 }
 0x1d6   :  { %9805 = vmatmul.mubr.f32.vlgmr.msra.gmra.mrb[20].mxu0 %v12459_v7 }
 0x1d7   :  { %9816 = vmatpush1.msra.mxu0 %v13108_v26  ;;  %9879 = vmatprep.mubr.f32.mxu0 %v12408_v0  ;;  %v10667_v26 = vand.u32 4294901760, %v13196_v4 }
 0x1d8   :  { %9889 = vmatprep.subr.mxu0 %v13084_v17 }
 0x1d9   :  { %v10668_v40 = vsub.f32 %v13196_v4, %v10667_v26 }
 0x1da   :  { %9340 = vmatmul.mubr.f32.vlgmr.msra.gmra.mrb[20].mxu1 %v12459_v7 }
 0x1db   :  { %9351 = vmatpush1.msra.mxu1 %v13122_v41  ;;  %9414 = vmatprep.mubr.f32.mxu1 %v12408_v0  ;;  %v10669_v41 = vand.u32 4294901760, %v10668_v40 }
 0x1dc   :  { %9424 = vmatprep.subr.mxu1 %v13091_v19 }
 0x1de   :  { %9882 = vmatmul.mubr.f32.vlgmr.msra.gmra.mrb[20].mxu0 %v12462_v11 }
 0x1df   :  { %9891 = vmatpush1.msra.mxu0 %v13093_v20  ;;  %9954 = vmatprep.mubr.f32.mxu0 %v12408_v0 }
 0x1e0   :  { %9967 = vmatprep.subr.mxu0 %v9731_v30 }
 0x1e2   :  { %9417 = vmatmul.mubr.f32.vlgmr.msra.gmra.mrb[20].mxu1 %v12462_v11 }
 0x1e3   :  { %9426 = vmatpush1.msra.mxu1 %v13104_v25  ;;  %9489 = vmatprep.mubr.f32.mxu1 %v12408_v0 }
 0x1e4   :  { %9502 = vmatprep.subr.mxu1 %v9266_v42 }
 0x1e6   :  { %9958 = vmatmul.mubr.f32.vlgmr.msra.gmra.mrb[20].mxu0 %v12465_v14 }
 0x1e7   :  { %9971 = vmatpush1.msra.mxu0 %v9737_v44  ;;  %10034 = vmatprep.mubr.f32.mxu0 %v12408_v0  ;;  %v87_v44 = vld [vmem:[#allocation2 + $0x180] sm:$0xff] }
 0x1e8   :  { %10043 = vmatprep.subr.mxu0 %v13084_v17  ;;  %v13269_v45 = vand.u32 4294901760, %v87_v44 }
 0x1ea   :  { %9493 = vmatmul.mubr.f32.vlgmr.msra.gmra.mrb[20].mxu1 %v12465_v14  ;;  %v13281_v53 = vsub.f32 %v87_v44, %v13269_v45 }
 0x1eb   :  { %9506 = vmatpush1.msra.mxu1 %v9272_v47  ;;  %9569 = vmatprep.mubr.f32.mxu1 %v12408_v0  ;;  %v201_v47 = vrot.slane %v13263_v50, %v12728_v32 }
 0x1ec   :  { %9578 = vmatprep.subr.mxu1 %v13091_v19  ;;  %v181_v19 = vrot.slane %v13087_v18, %v12828_v13  ;;  %v11590_v1 = vand.u32 4294901760, %v13281_v53 }
 0x1ed   :  { %v5461_v16 = vpop.f32.mrb[10].mxu0 }
 0x1ee   :  { %v12077_v17 = vadd.f32 %v5461_v16, %v185_v27  ;;  %v5463_v33 = vpop.f32.mrb[11].mxu0  ;;  %10036 = vmatmul.mubr.f32.vlgmr.msra.gmra.mrb[20].mxu0 %v12459_v7 }
 0x1ef   :  { %v12078_v21 = vadd.f32 %v5463_v33, %v189_v8  ;;  %10045 = vmatpush1.msra.mxu0 %v13093_v20  ;;  %10108 = vmatprep.mubr.f32.mxu0 %v12408_v0  ;;  %v11132_v8 = vand.u32 4294901760, %v11131_v61 }
 0x1f0   :  { %11977 = vst [vmem:[%s13462_s3 + $0xa0] sm:$0xff] %v12077_v17  ;;  %10582 = vmatprep.subr.mxu0 %v13174_v60 }
 0x1f1   :  { %11978 = vst [vmem:[%s13462_s3 + $0xa8] sm:$0xff] %v12078_v21  ;;  %v4996_v20 = vpop.f32.mrb[10].mxu1 }
 0x1f2   :  { %v12075_v28 = vadd.f32 %v4996_v20, %v177_v5  ;;  %v4998_v30 = vpop.f32.mrb[11].mxu1  ;;  %9571 = vmatmul.mubr.f32.vlgmr.msra.gmra.mrb[20].mxu1 %v12459_v7 }
 0x1f3   :  { %v12076_v31 = vadd.f32 %v4998_v30, %v181_v19  ;;  %9580 = vmatpush1.msra.mxu1 %v13104_v25  ;;  %9643 = vmatprep.mubr.f32.mxu1 %v12408_v0  ;;  %v10203_v25 = vsub.f32 %v13210_v22, %v10202_v29  ;;  %v209_v19 = vrot.slane %v13263_v50, %v12822_v10 }
 0x1f4   :  { %11975 = vst [vmem:[%s13462_s3 + $0x90] sm:$0xff] %v12075_v28  ;;  %10117 = vmatprep.subr.mxu1 %v13179_v62  ;;  %v92_v28 = vld [vmem:[#allocation4 + $0x20] sm:$0xff] }
 0x1f5   :  { %11976 = vst [vmem:[%s13462_s3 + $0x98] sm:$0xff] %v12076_v31  ;;  %v10204_v42 = vand.u32 4294901760, %v10203_v25  ;;  %v233_v30 = vrot.slane %v92_v28, %v12728_v32  ;;  %v237_v31 = vrot.slane %v92_v28, %v12734_v34  ;;  %v229_v25 = vrot.slane %v13263_v50, %v12924_v58 }
 0x1f6   :  { %10110 = vmatmul.mubr.f32.vlgmr.msra.gmra.mrb[20].mxu0 %v12459_v7  ;;  %v249_v43 = vrot.slane %v92_v28, %v12804_v2  ;;  %v253_v44 = vrot.slane %v92_v28, %v12808_v3  ;;  %v241_v46 = vrot.slane %v92_v28, %v12822_v10 }
 0x1f7   :  { %10584 = vmatpush1.msra.mxu0 %v13181_v63  ;;  %10647 = vmatprep.mubr.f32.mxu0 %v12408_v0 }
 0x1f8   :  { %10664 = vmatprep.subr.mxu0 %v10663_v39  ;;  %v225_v39 = vrot.slane %v13263_v50, %v12918_v56 }
 0x1fa   :  { %9645 = vmatmul.mubr.f32.vlgmr.msra.gmra.mrb[20].mxu1 %v12459_v7  ;;  %10653 = vmatmul.mubr.f32.vlgmr.msra.gmra.mrb[22].mxu0 %v12473_v23 }
 0x1fb   :  { %10119 = vmatpush1.msra.mxu1 %v13192_v59  ;;  %10182 = vmatprep.mubr.f32.mxu1 %v12408_v0 }
 0x1fc   :  { %10199 = vmatprep.subr.mxu1 %v10198_v37  ;;  %10670 = vmatpush1.msra.mxu0 %v10669_v41 }
 0x1fd   :  { %10733 = vmatprep.mubr.f32.mxu0 %v12408_v0  ;;  %10743 = vmatprep.subr.mxu0 %v13184_v6 }
 0x1fe   :  { %10188 = vmatmul.mubr.f32.vlgmr.msra.gmra.mrb[22].mxu1 %v12473_v23 }
 0x1ff   :  { %10205 = vmatpush1.msra.mxu1 %v10204_v42  ;;  %10268 = vmatprep.mubr.f32.mxu1 %v12408_v0 }
 0x200   :  { %10278 = vmatprep.subr.mxu1 %v13199_v9  ;;  %v11591_v9 = vsub.f32 %v13281_v53, %v11590_v1 }
 0x202   :  { %10735 = vmatmul.mubr.f32.vlgmr.msra.gmra.mrb[22].mxu0 %v12459_v7  ;;  %v11592_v16 = vand.u32 4294901760, %v11591_v9 }
 0x203   :  { %10746 = vmatpush1.msra.mxu0 %v13196_v4  ;;  %10809 = vmatprep.mubr.f32.mxu0 %v12408_v0 }
 0x204   :  { %10819 = vmatprep.subr.mxu0 %v13174_v60 }
 0x206   :  { %10270 = vmatmul.mubr.f32.vlgmr.msra.gmra.mrb[22].mxu1 %v12459_v7 }
 0x207   :  { %10281 = vmatpush1.msra.mxu1 %v13210_v22  ;;  %10344 = vmatprep.mubr.f32.mxu1 %v12408_v0  ;;  %v213_v22 = vrot.slane %v13263_v50, %v12828_v13 }
 0x208   :  { %10354 = vmatprep.subr.mxu1 %v13179_v62 }
 0x20a   :  { %10812 = vmatmul.mubr.f32.vlgmr.msra.gmra.mrb[22].mxu0 %v12462_v11 }
 0x20b   :  { %10821 = vmatpush1.msra.mxu0 %v13181_v63  ;;  %10884 = vmatprep.mubr.f32.mxu0 %v12408_v0 }
 0x20c   :  { %10897 = vmatprep.subr.mxu0 %v10661_v12 }
 0x20e   :  { %10347 = vmatmul.mubr.f32.vlgmr.msra.gmra.mrb[22].mxu1 %v12462_v11 }
 0x20f   :  { %10356 = vmatpush1.msra.mxu1 %v13192_v59  ;;  %10419 = vmatprep.mubr.f32.mxu1 %v12408_v0 }
 0x210   :  { %10432 = vmatprep.subr.mxu1 %v10196_v24 }
 0x212   :  { %10888 = vmatmul.mubr.f32.vlgmr.msra.gmra.mrb[22].mxu0 %v12465_v14 }
 0x213   :  { %10901 = vmatpush1.msra.mxu0 %v10667_v26  ;;  %10964 = vmatprep.mubr.f32.mxu0 %v12408_v0 }
 0x214   :  { %10973 = vmatprep.subr.mxu0 %v13174_v60 }
 0x216   :  { %10423 = vmatmul.mubr.f32.vlgmr.msra.gmra.mrb[22].mxu1 %v12465_v14 }
 0x217   :  { %10436 = vmatpush1.msra.mxu1 %v10202_v29  ;;  %10499 = vmatprep.mubr.f32.mxu1 %v12408_v0 }
 0x218   :  { %10508 = vmatprep.subr.mxu1 %v13179_v62  ;;  %v11126_v62 = vand.u32 4294901760, %v13284_v35 }
 0x219   :  { %v6391_v51 = vpop.f32.mrb[12].mxu0 }
 0x21a   :  { %v12081_v54 = vadd.f32 %v6391_v51, %v201_v47  ;;  %v6393_v55 = vpop.f32.mrb[13].mxu0  ;;  %10966 = vmatmul.mubr.f32.vlgmr.msra.gmra.mrb[22].mxu0 %v12459_v7  ;;  %v11127_v4 = vsub.f32 %v13284_v35, %v11126_v62 }
 0x21b   :  { %v12082_v60 = vadd.f32 %v6393_v55, %v205_v48  ;;  %10975 = vmatpush1.msra.mxu0 %v13181_v63  ;;  %11038 = vmatprep.mubr.f32.mxu0 %v12408_v0  ;;  %v245_v48 = vrot.slane %v92_v28, %v12828_v13 }
 0x21c   :  { %11981 = vst [vmem:[%s13462_s3 + $0xc0] sm:$0xff] %v12081_v54  ;;  %12025 = vmatprep.subr.mxu0 %v12408_v0  ;;  %v11128_v12 = vand.u32 4294901760, %v11127_v4  ;;  %v93_v54 = vld [vmem:[#allocation4 + $0x28] sm:$0xff] }
 0x21d   :  { %11982 = vst [vmem:[%s13462_s3 + $0xc8] sm:$0xff] %v12082_v60  ;;  %v5926_v18 = vpop.f32.mrb[12].mxu1  ;;  %v265_v55 = vrot.slane %v93_v54, %v12728_v32 }
 0x21e   :  { %v12079_v63 = vadd.f32 %v5926_v18, %v193_v57  ;;  %v5928_v6 = vpop.f32.mrb[13].mxu1  ;;  %10501 = vmatmul.mubr.f32.vlgmr.msra.gmra.mrb[22].mxu1 %v12459_v7  ;;  %v269_v57 = vrot.slane %v93_v54, %v12734_v34  ;;  %v261_v18 = vrot.slane %v92_v28, %v12924_v58 }
 0x21f   :  { %v12080_v27 = vadd.f32 %v5928_v6, %v197_v52  ;;  %10510 = vmatpush1.msra.mxu1 %v13192_v59  ;;  %10573 = vmatprep.mubr.f32.mxu1 %v12408_v0  ;;  %v11133_v59 = vsub.f32 %v11131_v61, %v11132_v8 }
 0x220   :  { %11979 = vst [vmem:[%s13462_s3 + $0xb0] sm:$0xff] %v12079_v63  ;;  %11047 = vmatprep.subr.mxu1 %v13267_v38 }
 0x221   :  { %11980 = vst [vmem:[%s13462_s3 + $0xb8] sm:$0xff] %v12080_v27  ;;  %v11134_v17 = vand.u32 4294901760, %v11133_v59  ;;  %v281_v27 = vrot.slane %v93_v54, %v12804_v2 }
 0x222   :  { %11040 = vmatmul.mubr.f32.vlgmr.msra.gmra.mrb[22].mxu0 %v12459_v7 }
 0x223   :  { %12026 = vmatpush3.msra.mxu0 %v13269_v45  ;;  %12027 = vmatprep.mubr.msk.f32.mxu0 %vm12409_vm1, %v12408_v0 }
 0x224   :  { %12030 = vmatprep.subr.mxu0 %v12408_v0 }
 0x226   :  { %10575 = vmatmul.mubr.f32.vlgmr.msra.gmra.mrb[22].mxu1 %v12459_v7  ;;  %12028 = vmatmul.mubr.f32.vlgmr.msra.gmra.mrb[24].mxu0 %v12473_v23 }
 0x227   :  { %11049 = vmatpush1.msra.mxu1 %v13277_v49  ;;  %11112 = vmatprep.mubr.f32.mxu1 %v12408_v0 }
 0x228   :  { %11129 = vmatprep.subr.mxu1 %v11128_v12  ;;  %12031 = vmatpush3.msra.mxu0 %v11592_v16  ;;  %v273_v12 = vrot.slane %v93_v54, %v12822_v10  ;;  %v12012_v10 = vld [vmem:[#allocation4 + $0x30] ss:$0 sm:$0xff] }
 0x229   :  { %12032 = vmatprep.mubr.msk.f32.mxu0 %vm12409_vm1, %v12408_v0  ;;  %12035 = vmatprep.subr.mxu0 %v12408_v0 }
 0x22a   :  { %11118 = vmatmul.mubr.f32.vlgmr.msra.gmra.mrb[24].mxu1 %v12473_v23  ;;  %v217_v23 = vrot.slane %v13263_v50, %v12804_v2 }
 0x22b   :  { %11135 = vmatpush1.msra.mxu1 %v11134_v17  ;;  %11198 = vmatprep.mubr.f32.mxu1 %v12408_v0  ;;  %v277_v17 = vrot.slane %v93_v54, %v12828_v13 }
 0x22c   :  { %11208 = vmatprep.subr.mxu1 %v13284_v35 }
 0x22e   :  { %12033 = vmatmul.mubr.f32.vlgmr.msra.gmra.mrb[24].mxu0 %v12459_v7 }
 0x22f   :  { %12036 = vmatpush3.msra.mxu0 %v13281_v53  ;;  %12037 = vmatprep.mubr.msk.f32.mxu0 %vm12409_vm1, %v12408_v0 }
 0x230   :  { %12040 = vmatprep.subr.mxu0 %v12408_v0 }
 0x232   :  { %11200 = vmatmul.mubr.f32.vlgmr.msra.gmra.mrb[24].mxu1 %v12459_v7 }
 0x233   :  { %11211 = vmatpush1.msra.mxu1 %v11131_v61  ;;  %11274 = vmatprep.mubr.f32.mxu1 %v12408_v0 }
 0x234   :  { %11284 = vmatprep.subr.mxu1 %v13267_v38 }
 0x236   :  { %12038 = vmatmul.mubr.f32.vlgmr.msra.gmra.mrb[24].mxu0 %v12462_v11 }
 0x237   :  { %12041 = vmatpush3.msra.mxu0 %v13269_v45  ;;  %12042 = vmatprep.mubr.msk.f32.mxu0 %vm12409_vm1, %v12408_v0 }
 0x238   :  { %12045 = vmatprep.subr.mxu0 %v12408_v0 }
 0x23a   :  { %11277 = vmatmul.mubr.f32.vlgmr.msra.gmra.mrb[24].mxu1 %v12462_v11  ;;  %v221_v11 = vrot.slane %v13263_v50, %v12808_v3 }
 0x23b   :  { %11286 = vmatpush1.msra.mxu1 %v13277_v49  ;;  %11349 = vmatprep.mubr.f32.mxu1 %v12408_v0 }
 0x23c   :  { %11362 = vmatprep.subr.mxu1 %v11126_v62  ;;  %v257_v62 = vrot.slane %v92_v28, %v12918_v56 }
 0x23e   :  { %12043 = vmatmul.mubr.f32.vlgmr.msra.gmra.mrb[24].mxu0 %v12465_v14 }
 0x23f   :  { %12046 = vmatpush3.msra.mxu0 %v11590_v1  ;;  %12047 = vmatprep.mubr.msk.f32.mxu0 %vm12409_vm1, %v12408_v0 }
 0x240   :  { %12050 = vmatprep.subr.mxu0 %v12408_v0 }
 0x242   :  { %11353 = vmatmul.mubr.f32.vlgmr.msra.gmra.mrb[24].mxu1 %v12465_v14 }
 0x243   :  { %11366 = vmatpush1.msra.mxu1 %v11132_v8  ;;  %11429 = vmatprep.mubr.f32.mxu1 %v12408_v0  ;;  %v285_v8 = vrot.slane %v93_v54, %v12808_v3 }
 0x244   :  { %11438 = vmatprep.subr.mxu1 %v13267_v38 }
 0x245   :  { %v7321_v33 = vpop.f32.mrb[14].mxu0 }
 0x246   :  { %v12085_v5 = vadd.f32 %v7321_v33, %v217_v23  ;;  %v7323_v21 = vpop.f32.mrb[15].mxu0  ;;  %12048 = vmatmul.mubr.f32.vlgmr.msra.gmra.mrb[24].mxu0 %v12459_v7 }
 0x247   :  { %v12086_v14 = vadd.f32 %v7323_v21, %v221_v11  ;;  %12051 = vmatpush3.msra.mxu0 %v13269_v45  ;;  %12052 = vmatprep.mubr.msk.f32.mxu0 %vm12409_vm1, %v12408_v0  ;;  %v289_v21 = vrot.slane %v93_v54, %v12918_v56 }
 0x248   :  { %11985 = vst [vmem:[%s13462_s3 + $0xe0] sm:$0xff] %v12085_v5 }
 0x249   :  { %11986 = vst [vmem:[%s13462_s3 + $0xe8] sm:$0xff] %v12086_v14  ;;  %v6856_v24 = vpop.f32.mrb[14].mxu1 }
 0x24a   :  { %v12083_v15 = vadd.f32 %v6856_v24, %v209_v19  ;;  %v6858_v26 = vpop.f32.mrb[15].mxu1  ;;  %11431 = vmatmul.mubr.f32.vlgmr.msra.gmra.mrb[24].mxu1 %v12459_v7  ;;  %v293_v19 = vrot.slane %v93_v54, %v12924_v58 }
 0x24b   :  { %v12084_v20 = vadd.f32 %v6858_v26, %v213_v22  ;;  %11440 = vmatpush1.msra.mxu1 %v13277_v49  ;;  %11503 = vmatprep.mubr.f32.mxu1 %v12408_v0 }
 0x24c   :  { %11983 = vst [vmem:[%s13462_s3 + $0xd0] sm:$0xff] %v12083_v15 }
 0x24d   :  { %11984 = vst [vmem:[%s13462_s3 + $0xd8] sm:$0xff] %v12084_v20 }
 0x24e   :  { %12053 = vmatmul.mubr.f32.vlgmr.msra.gmra.mrb[24].mxu0 %v12459_v7 }
 0x252   :  { %11505 = vmatmul.mubr.f32.vlgmr.msra.gmra.mrb[24].mxu1 %v12459_v7 }
 0x271   :  { %v8251_v29 = vpop.f32.mrb[16].mxu0 }
 0x272   :  { %v12089_v36 = vadd.f32 %v8251_v29, %v233_v30  ;;  %v8253_v0 = vpop.f32.mrb[17].mxu0 }
 0x273   :  { %v12090_v40 = vadd.f32 %v8253_v0, %v237_v31 }
 0x274   :  { %11989 = vst [vmem:[%s13462_s3 + $0x100] sm:$0xff] %v12089_v36 }
 0x275   :  { %11990 = vst [vmem:[%s13462_s3 + $0x108] sm:$0xff] %v12090_v40  ;;  %v7786_v7 = vpop.f32.mrb[16].mxu1 }
 0x276   :  { %v12087_v37 = vadd.f32 %v7786_v7, %v225_v39  ;;  %v7788_v41 = vpop.f32.mrb[17].mxu1 }
 0x277   :  { %v12088_v42 = vadd.f32 %v7788_v41, %v229_v25 }
 0x278   :  { %11987 = vst [vmem:[%s13462_s3 + $0xf0] sm:$0xff] %v12087_v37 }
 0x279   :  { %11988 = vst [vmem:[%s13462_s3 + $0xf8] sm:$0xff] %v12088_v42 }
 0x29d   :  { %v9181_v50 = vpop.f32.mrb[18].mxu0 }
 0x29e   :  { %v12093_v38 = vadd.f32 %v9181_v50, %v249_v43  ;;  %v9183_v45 = vpop.f32.mrb[19].mxu0 }
 0x29f   :  { %v12094_v47 = vadd.f32 %v9183_v45, %v253_v44 }
 0x2a0   :  { %11993 = vst [vmem:[%s13462_s3 + $0x120] sm:$0xff] %v12093_v38 }
 0x2a1   :  { %11994 = vst [vmem:[%s13462_s3 + $0x128] sm:$0xff] %v12094_v47  ;;  %v8716_v49 = vpop.f32.mrb[18].mxu1 }
 0x2a2   :  { %v12091_v53 = vadd.f32 %v8716_v49, %v241_v46  ;;  %v8718_v35 = vpop.f32.mrb[19].mxu1 }
 0x2a3   :  { %v12092_v51 = vadd.f32 %v8718_v35, %v245_v48 }
 0x2a4   :  { %11991 = vst [vmem:[%s13462_s3 + $0x110] sm:$0xff] %v12091_v53 }
 0x2a5   :  { %11992 = vst [vmem:[%s13462_s3 + $0x118] sm:$0xff] %v12092_v51 }
 0x2c9   :  { %v10111_v60 = vpop.f32.mrb[20].mxu0 }
 0x2ca   :  { %v12097_v52 = vadd.f32 %v10111_v60, %v265_v55  ;;  %v10113_v61 = vpop.f32.mrb[21].mxu0 }
 0x2cb   :  { %v12098_v1 = vadd.f32 %v10113_v61, %v269_v57 }
 0x2cc   :  { %11997 = vst [vmem:[%s13462_s3 + $0x140] sm:$0xff] %v12097_v52 }
 0x2cd   :  { %11998 = vst [vmem:[%s13462_s3 + $0x148] sm:$0xff] %v12098_v1  ;;  %v9646_v63 = vpop.f32.mrb[20].mxu1 }
 0x2ce   :  { %v12095_v32 = vadd.f32 %v9646_v63, %v257_v62  ;;  %v9648_v6 = vpop.f32.mrb[21].mxu1 }
 0x2cf   :  { %v12096_v34 = vadd.f32 %v9648_v6, %v261_v18 }
 0x2d0   :  { %11995 = vst [vmem:[%s13462_s3 + $0x130] sm:$0xff] %v12095_v32 }
 0x2d1   :  { %11996 = vst [vmem:[%s13462_s3 + $0x138] sm:$0xff] %v12096_v34 }
 0x2f5   :  { %v11041_v4 = vpop.f32.mrb[22].mxu0 }
 0x2f6   :  { %v12101_v9 = vadd.f32 %v11041_v4, %v281_v27  ;;  %v11043_v59 = vpop.f32.mrb[23].mxu0 }
 0x2f7   :  { %v12102_v16 = vadd.f32 %v11043_v59, %v285_v8 }
 0x2f8   :  { %12001 = vst [vmem:[%s13462_s3 + $0x160] sm:$0xff] %v12101_v9 }
 0x2f9   :  { %12002 = vst [vmem:[%s13462_s3 + $0x168] sm:$0xff] %v12102_v16  ;;  %v10576_v23 = vpop.f32.mrb[22].mxu1 }
 0x2fa   :  { %v12099_v2 = vadd.f32 %v10576_v23, %v273_v12  ;;  %v10578_v11 = vpop.f32.mrb[23].mxu1 }
 0x2fb   :  { %v12100_v3 = vadd.f32 %v10578_v11, %v277_v17 }
 0x2fc   :  { %11999 = vst [vmem:[%s13462_s3 + $0x150] sm:$0xff] %v12099_v2 }
 0x2fd   :  { %12000 = vst [vmem:[%s13462_s3 + $0x158] sm:$0xff] %v12100_v3 }
 0x321   :  { %v11953_v13 = vpop.f32.mrb[24].mxu0 }
 0x322   :  { %v12105_v33 = vadd.f32 %v12012_v10, %v11953_v13  ;;  %v12054_v5 = vpop.f32.mrb[25].mxu0 }
 0x324   :  { %12005 = vst [vmem:[%s13462_s3 + $0x180] sm:$0xff] %v12105_v33 }
 0x325   :  { %v11506_v14 = vpop.f32.mrb[24].mxu1 }
 0x326   :  { %v12103_v22 = vadd.f32 %v11506_v14, %v289_v21  ;;  %v11508_v24 = vpop.f32.mrb[25].mxu1 }
 0x327   :  { %v12104_v15 = vadd.f32 %v11508_v24, %v293_v19 }
 0x328   :  { %12003 = vst [vmem:[%s13462_s3 + $0x170] sm:$0xff] %v12103_v22 }
 0x329   :  { %12004 = vst [vmem:[%s13462_s3 + $0x178] sm:$0xff] %v12104_v15 }
 0x32a   :  { %12010 = vsyncpa [#allocation3], 1 }
 0x32b   :  { %12011 = vsyncpa [#allocation5], 1 }

</bundles_post_ra>
